<compile_context>
chip_gen: v7x
topology: tpu7x:2x2x1
jax: 0.10.0
libtpu: 0.0.40
codegen_flags: <defaults>
</compile_context>

<pallas_src>
import functools

import jax
import jax.numpy as jnp
from jax.experimental import pallas as pl
from jax.experimental.pallas import tpu as pltpu


def _round_up(x, m):
    return (x + m - 1) // m * m


# Single-buffer request for grid-invariant blocks (weights/biases never change).
_SINGLE_BUF = pl.Buffered(1) if hasattr(pl, "Buffered") else None


# ----------------------------------------------------------------------------
# Gate-blocked zero padding helpers (PyTorch packs gates as (r|z|n) along dim 0).
# ----------------------------------------------------------------------------
def _pad_gate_matrix(w, h_real, h_pad, in_real, in_pad):
    """w: (3*h_real, in_real) -> (3*h_pad, in_pad), zero padding per gate block."""
    w3 = w.reshape(3, h_real, in_real)
    w3 = jnp.pad(w3, ((0, 0), (0, h_pad - h_real), (0, in_pad - in_real)))
    return w3.reshape(3 * h_pad, in_pad)


def _pad_gate_bias(b, h_real, h_pad):
    """b: (3*h_real,) -> (1, 3*h_pad), zero padding per gate block."""
    return jnp.pad(b.reshape(3, h_real), ((0, 0), (0, h_pad - h_real))).reshape(1, 3 * h_pad)


# ----------------------------------------------------------------------------
# VMEM-budget-driven tiling.
# ----------------------------------------------------------------------------
def _vmem_capacity_bytes():
    try:
        return int(pltpu.get_tpu_info().vmem_capacity_bytes)
    except Exception:
        return 64 * 1024 * 1024  # conservative fallback (v7x per-core VMEM)


def _auto_time_chunk(T, Bb, in_pad_max, Hp, gi_bytes, mm_bytes, io_bytes,
                     budget, max_chunk=512):
    # Grid-invariant residents: W_ih^T + W_hh^T (counted with margin), h0 block,
    # f32 hidden carry, biases.
    fixed = (in_pad_max * 3 * Hp + 2 * Hp * 3 * Hp) * mm_bytes
    fixed += 2 * Bb * Hp * io_bytes + Bb * Hp * 4 + 8 * 3 * Hp * 4
    # Per-time-step cost: 2x-buffered x block + 2x-buffered out block + GI scratch.
    per_t = Bb * (2 * in_pad_max * io_bytes + 2 * Hp * io_bytes + 3 * Hp * gi_bytes)
    avail = budget - fixed
    tc = avail // per_t if avail > per_t else 1
    return int(max(1, min(T, tc, max_chunk)))


# ----------------------------------------------------------------------------
# Fused GRU layer kernel: in-kernel input projection + serial recurrence.
#   Block shapes per grid step (b, c):
#     x_ref   : (Tc, Bb, Din)   time-major layer input chunk
#     h0_ref  : (Bb, Hp)        initial hidden state for this batch block
#     wih_ref : (Din, 3Hp)      W_ih^T  (grid-invariant, single-buffered)
#     whh_ref : (Hp, 3Hp)       W_hh^T  (grid-invariant, single-buffered)
#     bih_ref : (1, 3Hp)        b_ih
#     bhh_ref : (1, 3Hp)        b_hh
#     out_ref : (Tc, Bb, Hp)
#     h_scr   : (Bb, Hp) f32    hidden carry across time chunks
#     gi_scr  : (Tc*Bb, 3Hp)    per-chunk GI (never written to HBM)
# ----------------------------------------------------------------------------
def _gru_layer_kernel(x_ref, h0_ref, wih_ref, whh_ref, bih_ref, bhh_ref,
                      out_ref, h_scr, gi_scr, *,
                      hidden_pad, in_pad, chunk, batch_block, t_real,
                      guard_tail, mm_dtype):
    c = pl.program_id(1)
    Hp = hidden_pad
    Bb = batch_block

    @pl.when(c == 0)
    def _():
        h_scr[...] = h0_ref[...].astype(jnp.float32)

    # ---- Phase 1 (parallel over the chunk): GI = x @ W_ih^T + b_ih as one large
    #      MXU matmul straight into VMEM scratch (replaces the old XLA einsum +
    #      full HBM round trip of the (T, B, 3Hp) GI tensor). ----
    x2d = x_ref[...].reshape(chunk * Bb, in_pad).astype(mm_dtype)
    gi = jnp.dot(x2d, wih_ref[...], preferred_element_type=jnp.float32)
    gi_scr[...] = (gi + bih_ref[...].astype(jnp.float32)).astype(gi_scr.dtype)

    bhh = bhh_ref[...].astype(jnp.float32)          # (1, 3Hp), tiny -> hoist

    # ---- Phase 2: strictly sequential recurrence over the chunk. ----
    def step(t, carry):
        def do_step():
            row = pl.multiple_of(t * Bb, Bb)        # sublane-aligned slice of GI
            gi_t = gi_scr[pl.ds(row, Bb), :].astype(jnp.float32)     # (Bb, 3Hp)
            h_prev = h_scr[...]                                       # (Bb, Hp) f32
            gh = jnp.dot(h_prev.astype(mm_dtype), whh_ref[...],
                         preferred_element_type=jnp.float32) + bhh
            # Lane-aligned gate slices (Hp is a multiple of 128).
            r = jax.nn.sigmoid(gi_t[:, 0 * Hp:1 * Hp] + gh[:, 0 * Hp:1 * Hp])
            z = jax.nn.sigmoid(gi_t[:, 1 * Hp:2 * Hp] + gh[:, 1 * Hp:2 * Hp])
            n = jnp.tanh(gi_t[:, 2 * Hp:3 * Hp] + r * gh[:, 2 * Hp:3 * Hp])
            h_new = (1.0 - z) * n + z * h_prev
            h_scr[...] = h_new
            out_ref[t] = h_new.astype(out_ref.dtype)

        if guard_tail:
            # Skip padded tail time steps: they would be pure wasted serial work.
            pl.when(c * chunk + t < t_real)(do_step)
        else:
            do_step()
        return carry

    # Partial unroll: lets the scheduler overlap step t's store / step t+1's GI
    # load and W_hh streaming with step t's EUP (sigmoid/tanh) + MXU latency.
    jax.lax.fori_loop(0, chunk, step, 0,
                      unroll=(chunk if chunk <= 16 else 4))


def _gru_layer_fused(x_tm, h0, wih_t, whh_t, bih_row, bhh_row, *,
                     t_real, time_chunk, batch_block, out_dtype, gi_dtype,
                     mm_dtype, vmem_limit_bytes):
    Tp, Bp, in_pad = x_tm.shape
    Hp = whh_t.shape[0]
    Tc, Bb = time_chunk, batch_block
    assert Tp % Tc == 0 and Bp % Bb == 0
    n_chunks = Tp // Tc
    n_bblocks = Bp // Bb

    kernel = functools.partial(
        _gru_layer_kernel, hidden_pad=Hp, in_pad=in_pad, chunk=Tc,
        batch_block=Bb, t_real=t_real, guard_tail=(Tp != t_real),
        mm_dtype=mm_dtype)

    out = pl.pallas_call(
        kernel,
        out_shape=jax.ShapeDtypeStruct((Tp, Bp, Hp), out_dtype),
        grid_spec=pltpu.PrefetchScalarGridSpec(
            num_scalar_prefetch=0,
            grid=(n_bblocks, n_chunks),
            in_specs=[
                pl.BlockSpec((Tc, Bb, in_pad), lambda b, c: (c, b, 0)),       # x chunk
                pl.BlockSpec((Bb, Hp), lambda b, c: (b, 0)),                  # h0
                pl.BlockSpec((in_pad, 3 * Hp), lambda b, c: (0, 0),
                             pipeline_mode=_SINGLE_BUF),                      # W_ih^T
                pl.BlockSpec((Hp, 3 * Hp), lambda b, c: (0, 0),
                             pipeline_mode=_SINGLE_BUF),                      # W_hh^T
                pl.BlockSpec((1, 3 * Hp), lambda b, c: (0, 0),
                             pipeline_mode=_SINGLE_BUF),                      # b_ih
                pl.BlockSpec((1, 3 * Hp), lambda b, c: (0, 0),
                             pipeline_mode=_SINGLE_BUF),                      # b_hh
            ],
            out_specs=pl.BlockSpec((Tc, Bb, Hp), lambda b, c: (c, b, 0)),
            scratch_shapes=[
                pltpu.VMEM((Bb, Hp), jnp.float32),         # hidden carry
                pltpu.VMEM((Tc * Bb, 3 * Hp), gi_dtype),   # per-chunk GI
            ]),
        compiler_params=pltpu.CompilerParams(
            # Batch blocks are independent (usable by v7x's second TensorCore);
            # the time-chunk axis is strictly sequential.
            dimension_semantics=("parallel", "arbitrary"),
            vmem_limit_bytes=vmem_limit_bytes),
    )(x_tm, h0, wih_t, whh_t, bih_row, bhh_row)
    return out


# ----------------------------------------------------------------------------
# Cor_GRUNet forward: stacked GRU layers.
#   x: (B, T, input_dim), h: (n_layers, B, H)  ->  out: (B, T, H), h_n: (L, B, H)
# ----------------------------------------------------------------------------
def cor_grunet_forward(x, h, params, *, time_chunk=None, batch_block=None,
                       matmul_dtype=None):
    B, T, D = x.shape
    n_layers = len(params)
    H = params[0][1].shape[1]
    dtype = x.dtype
    mm_dtype = jnp.dtype(matmul_dtype) if matmul_dtype is not None else jnp.dtype(dtype)
    low_precision = (mm_dtype == jnp.dtype(jnp.bfloat16))

    # Storage dtypes: in bf16-matmul mode, store GI (VMEM) and inter-layer
    # activations (HBM) in bf16 as well; gate math + hidden carry stay f32.
    gi_dtype = jnp.bfloat16 if low_precision else jnp.float32
    inter_dtype = jnp.bfloat16 if low_precision else dtype

    sublane = 16 if low_precision else 8      # bf16 vregs pack 16 sublanes
    Hp = _round_up(H, 128)                    # lane-aligned gate slices & dense stores
    Dp = _round_up(D, 128)                    # lane-aligned K for the in-kernel GI matmul
    Bp = _round_up(B, sublane)

    # Batch blocking: single block for small batch; 128-row blocks otherwise so
    # v7x's two TensorCores can split the "parallel" batch axis.
    if batch_block is None:
        batch_block = 128 if Bp > 128 else Bp
    Bb = _round_up(min(batch_block, Bp), sublane)
    Bp = _round_up(Bp, Bb)

    # VMEM-budget-driven time chunk + explicit scoped-VMEM limit (v5e scoped
    # default is 16 MiB; v7x physical VMEM is 64 MiB — one fixed Tc can't serve both).
    cap = _vmem_capacity_bytes()
    vmem_limit = int(min(0.8 * cap, 112 * 2 ** 20))
    if time_chunk is None:
        time_chunk = _auto_time_chunk(
            T, Bb, max(Dp, Hp), Hp,
            gi_bytes=jnp.dtype(gi_dtype).itemsize,
            mm_bytes=jnp.dtype(mm_dtype).itemsize,
            io_bytes=4,
            budget=int(0.55 * cap))
    Tc = max(1, min(time_chunk, T))
    Tp = _round_up(T, Tc)

    # Layer-0 input: pad batch + feature dims, go time-major once (this tensor is
    # 3Hp/D times smaller than the old GI intermediate), pad the time axis.
    x_tm = jnp.transpose(jnp.pad(x, ((0, Bp - B), (0, 0), (0, Dp - D))), (1, 0, 2))
    x_tm = jnp.pad(x_tm, ((0, Tp - T), (0, 0), (0, 0)))          # (Tp, Bp, Dp)
    hp = jnp.pad(h, ((0, 0), (0, Bp - B), (0, Hp - H)))          # (L, Bp, Hp)

    layer_in = x_tm
    h_last = []
    for layer_idx, (w_ih, w_hh, b_ih, b_hh) in enumerate(params):
        in_real = w_ih.shape[1]
        in_pad = Dp if layer_idx == 0 else Hp

        wih_t = jnp.transpose(_pad_gate_matrix(w_ih, H, Hp, in_real, in_pad)).astype(mm_dtype)
        whh_t = jnp.transpose(_pad_gate_matrix(w_hh, H, Hp, H, Hp)).astype(mm_dtype)
        bih_r = _pad_gate_bias(b_ih, H, Hp).astype(jnp.float32)
        bhh_r = _pad_gate_bias(b_hh, H, Hp).astype(jnp.float32)

        layer_out_dtype = dtype if layer_idx == n_layers - 1 else inter_dtype
        layer_out = _gru_layer_fused(
            layer_in, hp[layer_idx], wih_t, whh_t, bih_r, bhh_r,
            t_real=T, time_chunk=Tc, batch_block=Bb, out_dtype=layer_out_dtype,
            gi_dtype=gi_dtype, mm_dtype=mm_dtype, vmem_limit_bytes=vmem_limit)

        h_last.append(layer_out[T - 1])   # final hidden of this layer = out at t=T-1
        layer_in = layer_out              # stays time-major & padded for next layer

    out = jnp.transpose(layer_in[:T, :B, :H], (1, 0, 2))         # back to batch_first
    h_n = jnp.stack(h_last, axis=0)[:, :B, :H].astype(dtype)
    return out, h_n


# ----------------------------------------------------------------------------
# Deterministic parameter init (mirrors the module's __init__):
#   bias -> 0, weight_ih -> kaiming normal, weight_hh -> orthogonal.
# ----------------------------------------------------------------------------
def init_params(key, input_dim, hidden_dim, n_layers):
    params = []
    ortho = jax.nn.initializers.orthogonal()
    for layer in range(n_layers):
        in_dim = input_dim if layer == 0 else hidden_dim
        key, k1, k2 = jax.random.split(key, 3)
        w_ih = jax.random.normal(k1, (3 * hidden_dim, in_dim), jnp.float32) * jnp.sqrt(2.0 / in_dim)
        w_hh = ortho(k2, (3 * hidden_dim, hidden_dim), jnp.float32)
        b_ih = jnp.zeros((3 * hidden_dim,), jnp.float32)
        b_hh = jnp.zeros((3 * hidden_dim,), jnp.float32)
        params.append((w_ih, w_hh, b_ih, b_hh))
    return params


# ----------------------------------------------------------------------------
# Pure-JAX reference (lax.scan) for correctness checking.
# ----------------------------------------------------------------------------
def gru_reference(x, h, params):
    x_tbd = jnp.transpose(x, (1, 0, 2))
    h_out = []
    layer_in = x_tbd
    for layer_idx, (w_ih, w_hh, b_ih, b_hh) in enumerate(params):
        H = w_hh.shape[1]

        def step(h_prev, x_t, w_ih=w_ih, w_hh=w_hh, b_ih=b_ih, b_hh=b_hh, H=H):
            gi = x_t @ w_ih.T + b_ih
            gh = h_prev @ w_hh.T + b_hh
            r = jax.nn.sigmoid(gi[:, :H] + gh[:, :H])
            z = jax.nn.sigmoid(gi[:, H:2 * H] + gh[:, H:2 * H])
            n = jnp.tanh(gi[:, 2 * H:] + r * gh[:, 2 * H:])
            h_new = (1.0 - z) * n + z * h_prev
            return h_new, h_new

        hn, outs = jax.lax.scan(step, h[layer_idx], layer_in)
        h_out.append(hn)
        layer_in = outs
    return jnp.transpose(layer_in, (1, 0, 2)), jnp.stack(h_out, axis=0)


if __name__ == "__main__":
    B, T, INPUT_DIM, HIDDEN_DIM, N_LAYERS = 2, 8, 4, 32, 2

    key = jax.random.PRNGKey(0)
    kx, kh, kp = jax.random.split(key, 3)
    x = jax.random.normal(kx, (B, T, INPUT_DIM), jnp.float32)
    h0 = jax.random.normal(kh, (N_LAYERS, B, HIDDEN_DIM), jnp.float32)
    params = init_params(kp, INPUT_DIM, HIDDEN_DIM, N_LAYERS)

    # matmul_dtype=jnp.bfloat16 is recommended on v6e/v7x; f32 here so the strict
    # check against the f32 reference passes.
    fwd = jax.jit(cor_grunet_forward)
    out, h_n = fwd(x, h0, params)
    out = jax.block_until_ready(out)
    h_n = jax.block_until_ready(h_n)

    ref_out, ref_h = gru_reference(x, h0, params)
    assert out.shape == (B, T, HIDDEN_DIM) and h_n.shape == (N_LAYERS, B, HIDDEN_DIM)
    assert jnp.allclose(out, ref_out, atol=1e-4), "output mismatch vs reference"
    assert jnp.allclose(h_n, ref_h, atol=1e-4), "hidden-state mismatch vs reference"

    print("KERNEL_OK")
</pallas_src>

<mosaic_0001>
module attributes {stable_mosaic.version = 11 : i64} {
  func.func @_gru_layer_kernel(%arg0: i32, %arg1: i32, %arg2: memref<8x8x128xf32, #tpu.memory_space<vmem>>, %arg3: memref<8x128xf32, #tpu.memory_space<vmem>>, %arg4: memref<128x384xf32, #tpu.memory_space<vmem>>, %arg5: memref<128x384xf32, #tpu.memory_space<vmem>>, %arg6: memref<1x384xf32, #tpu.memory_space<vmem>>, %arg7: memref<1x384xf32, #tpu.memory_space<vmem>>, %arg8: memref<8x8x128xf32, #tpu.memory_space<vmem>>, %arg9: memref<8x128xf32, #tpu.memory_space<vmem>>, %arg10: memref<64x384xf32, #tpu.memory_space<vmem>>) attributes {dimension_semantics = [#tpu.dimension_semantics<parallel>, #tpu.dimension_semantics<arbitrary>], iteration_bounds = array<i64: 1, 1>, scalar_prefetch = 0 : i64, scratch_operands = 2 : i64, tpu.core_type = #tpu.core_type<tc>, window_params = [{transform_indices = @transform_0, window_bounds = array<i64: 8, 8, 128>}, {transform_indices = @transform_1, window_bounds = array<i64: 8, 128>}, {pipeline_mode = #tpu.pipeline_mode<synchronous>, transform_indices = @transform_2, window_bounds = array<i64: 128, 384>}, {pipeline_mode = #tpu.pipeline_mode<synchronous>, transform_indices = @transform_3, window_bounds = array<i64: 128, 384>}, {pipeline_mode = #tpu.pipeline_mode<synchronous>, transform_indices = @transform_4, window_bounds = array<i64: 1, 384>}, {pipeline_mode = #tpu.pipeline_mode<synchronous>, transform_indices = @transform_5, window_bounds = array<i64: 1, 384>}, {transform_indices = @transform_6, window_bounds = array<i64: 8, 8, 128>}]} {
    %c0_i32 = arith.constant 0 : i32
    %0 = arith.cmpi eq, %arg1, %c0_i32 : i32
    %1 = arith.extui %0 : i1 to i32
    %c0_i32_0 = arith.constant 0 : i32
    %2 = arith.cmpi ne, %1, %c0_i32_0 : i32
    scf.if %2 {
      %c0_124 = arith.constant 0 : index
      %c0_125 = arith.constant 0 : index
      %332 = vector.load %arg3[%c0_124, %c0_125] : memref<8x128xf32, #tpu.memory_space<vmem>>, vector<8x128xf32>
      %c0_126 = arith.constant 0 : index
      %c0_127 = arith.constant 0 : index
      %333 = vector.load %arg9[%c0_126, %c0_127] : memref<8x128xf32, #tpu.memory_space<vmem>>, vector<8x128xf32>
      tpu.vector_store %arg9[%c0_126, %c0_127], %332 {strides = array<i32>} : memref<8x128xf32, #tpu.memory_space<vmem>>, vector<8x128xf32>,
    } else {
    }
    %c0 = arith.constant 0 : index
    %c0_1 = arith.constant 0 : index
    %c0_2 = arith.constant 0 : index
    %3 = vector.load %arg2[%c0, %c0_1, %c0_2] : memref<8x8x128xf32, #tpu.memory_space<vmem>>, vector<8x8x128xf32>
    %4 = vector.shape_cast %3 : vector<8x8x128xf32> to vector<64x128xf32>
    %c0_3 = arith.constant 0 : index
    %c0_4 = arith.constant 0 : index
    %5 = vector.load %arg4[%c0_3, %c0_4] : memref<128x384xf32, #tpu.memory_space<vmem>>, vector<128x384xf32>
    %cst = arith.constant dense<0.000000e+00> : vector<64x384xf32>
    %6 = tpu.matmul %4, %5, %cst {dimension_numbers = #tpu.dot_dimension_numbers<[1], [0], [0], [1], [0, 0, 1, 1], [], []>} : vector<64x128xf32>, vector<128x384xf32>, vector<64x384xf32> -> vector<64x384xf32>
    %c0_5 = arith.constant 0 : index
    %c0_6 = arith.constant 0 : index
    %7 = vector.load %arg6[%c0_5, %c0_6] : memref<1x384xf32, #tpu.memory_space<vmem>>, vector<1x384xf32>
    %8 = vector.broadcast %7 : vector<1x384xf32> to vector<64x384xf32>
    %9 = arith.addf %6, %8 : vector<64x384xf32>
    %c0_7 = arith.constant 0 : index
    %c0_8 = arith.constant 0 : index
    %10 = vector.load %arg10[%c0_7, %c0_8] : memref<64x384xf32, #tpu.memory_space<vmem>>, vector<64x384xf32>
    tpu.vector_store %arg10[%c0_7, %c0_8], %9 {strides = array<i32>} : memref<64x384xf32, #tpu.memory_space<vmem>>, vector<64x384xf32>,
    %c0_9 = arith.constant 0 : index
    %c0_10 = arith.constant 0 : index
    %11 = vector.load %arg7[%c0_9, %c0_10] : memref<1x384xf32, #tpu.memory_space<vmem>>, vector<1x384xf32>
    %c0_i32_11 = arith.constant 0 : i32
    %c8_i32 = arith.constant 8 : i32
    %12 = arith.muli %c0_i32_11, %c8_i32 : i32
    %13 = tpu.assume_multiple %12, 8 : i32
    %14 = arith.index_cast %13 : i32 to index
    %c0_12 = arith.constant 0 : index
    %15 = vector.load %arg10[%14, %c0_12] : memref<64x384xf32, #tpu.memory_space<vmem>>, vector<8x384xf32>
    %c0_13 = arith.constant 0 : index
    %c0_14 = arith.constant 0 : index
    %16 = vector.load %arg9[%c0_13, %c0_14] : memref<8x128xf32, #tpu.memory_space<vmem>>, vector<8x128xf32>
    %c0_15 = arith.constant 0 : index
    %c0_16 = arith.constant 0 : index
    %17 = vector.load %arg5[%c0_15, %c0_16] : memref<128x384xf32, #tpu.memory_space<vmem>>, vector<128x384xf32>
    %cst_17 = arith.constant dense<0.000000e+00> : vector<8x384xf32>
    %18 = tpu.matmul %16, %17, %cst_17 {dimension_numbers = #tpu.dot_dimension_numbers<[1], [0], [0], [1], [0, 0, 1, 1], [], []>} : vector<8x128xf32>, vector<128x384xf32>, vector<8x384xf32> -> vector<8x384xf32>
    %19 = vector.broadcast %11 : vector<1x384xf32> to vector<8x384xf32>
    %20 = arith.addf %18, %19 : vector<8x384xf32>
    %21 = vector.extract_strided_slice %15 {offsets = [0, 0], sizes = [8, 128], strides = [1, 1]} : vector<8x384xf32> to vector<8x128xf32>
    %22 = vector.extract_strided_slice %20 {offsets = [0, 0], sizes = [8, 128], strides = [1, 1]} : vector<8x384xf32> to vector<8x128xf32>
    %23 = arith.addf %21, %22 : vector<8x128xf32>
    %24 = arith.negf %23 : vector<8x128xf32>
    %25 = math.exp %24 : vector<8x128xf32>
    %cst_18 = arith.constant 1.000000e+00 : f32
    %26 = vector.broadcast %cst_18 : f32 to vector<8x128xf32>
    %27 = arith.addf %26, %25 : vector<8x128xf32>
    %28 = arith.divf %26, %27 : vector<8x128xf32>
    %29 = vector.extract_strided_slice %15 {offsets = [0, 128], sizes = [8, 128], strides = [1, 1]} : vector<8x384xf32> to vector<8x128xf32>
    %30 = vector.extract_strided_slice %20 {offsets = [0, 128], sizes = [8, 128], strides = [1, 1]} : vector<8x384xf32> to vector<8x128xf32>
    %31 = arith.addf %29, %30 : vector<8x128xf32>
    %32 = arith.negf %31 : vector<8x128xf32>
    %33 = math.exp %32 : vector<8x128xf32>
    %cst_19 = arith.constant 1.000000e+00 : f32
    %34 = vector.broadcast %cst_19 : f32 to vector<8x128xf32>
    %35 = arith.addf %34, %33 : vector<8x128xf32>
    %36 = arith.divf %34, %35 : vector<8x128xf32>
    %37 = vector.extract_strided_slice %15 {offsets = [0, 256], sizes = [8, 128], strides = [1, 1]} : vector<8x384xf32> to vector<8x128xf32>
    %38 = vector.extract_strided_slice %20 {offsets = [0, 256], sizes = [8, 128], strides = [1, 1]} : vector<8x384xf32> to vector<8x128xf32>
    %39 = arith.mulf %28, %38 : vector<8x128xf32>
    %40 = arith.addf %37, %39 : vector<8x128xf32>
    %41 = math.tanh %40 : vector<8x128xf32>
    %cst_20 = arith.constant 1.000000e+00 : f32
    %42 = vector.broadcast %cst_20 : f32 to vector<8x128xf32>
    %43 = arith.subf %42, %36 : vector<8x128xf32>
    %44 = arith.mulf %43, %41 : vector<8x128xf32>
    %45 = arith.mulf %36, %16 : vector<8x128xf32>
    %46 = arith.addf %44, %45 : vector<8x128xf32>
    %c0_21 = arith.constant 0 : index
    %c0_22 = arith.constant 0 : index
    %47 = vector.load %arg9[%c0_21, %c0_22] : memref<8x128xf32, #tpu.memory_space<vmem>>, vector<8x128xf32>
    tpu.vector_store %arg9[%c0_21, %c0_22], %46 {strides = array<i32>} : memref<8x128xf32, #tpu.memory_space<vmem>>, vector<8x128xf32>,
    %48 = arith.index_cast %c0_i32_11 : i32 to index
    %c0_23 = arith.constant 0 : index
    %c0_24 = arith.constant 0 : index
    %49 = vector.load %arg8[%48, %c0_23, %c0_24] : memref<8x8x128xf32, #tpu.memory_space<vmem>>, vector<1x8x128xf32>
    %50 = vector.shape_cast %49 : vector<1x8x128xf32> to vector<8x128xf32>
    %51 = vector.shape_cast %46 : vector<8x128xf32> to vector<1x8x128xf32>
    tpu.vector_store %arg8[%48, %c0_23, %c0_24], %51 {strides = array<i32>} : memref<8x8x128xf32, #tpu.memory_space<vmem>>, vector<1x8x128xf32>,
    %c1_i32 = arith.constant 1 : i32
    %c8_i32_25 = arith.constant 8 : i32
    %52 = arith.muli %c1_i32, %c8_i32_25 : i32
    %53 = tpu.assume_multiple %52, 8 : i32
    %54 = arith.index_cast %53 : i32 to index
    %c0_26 = arith.constant 0 : index
    %55 = vector.load %arg10[%54, %c0_26] : memref<64x384xf32, #tpu.memory_space<vmem>>, vector<8x384xf32>
    %c0_27 = arith.constant 0 : index
    %c0_28 = arith.constant 0 : index
    %56 = vector.load %arg9[%c0_27, %c0_28] : memref<8x128xf32, #tpu.memory_space<vmem>>, vector<8x128xf32>
    %c0_29 = arith.constant 0 : index
    %c0_30 = arith.constant 0 : index
    %57 = vector.load %arg5[%c0_29, %c0_30] : memref<128x384xf32, #tpu.memory_space<vmem>>, vector<128x384xf32>
    %cst_31 = arith.constant dense<0.000000e+00> : vector<8x384xf32>
    %58 = tpu.matmul %56, %57, %cst_31 {dimension_numbers = #tpu.dot_dimension_numbers<[1], [0], [0], [1], [0, 0, 1, 1], [], []>} : vector<8x128xf32>, vector<128x384xf32>, vector<8x384xf32> -> vector<8x384xf32>
    %59 = vector.broadcast %11 : vector<1x384xf32> to vector<8x384xf32>
    %60 = arith.addf %58, %59 : vector<8x384xf32>
    %61 = vector.extract_strided_slice %55 {offsets = [0, 0], sizes = [8, 128], strides = [1, 1]} : vector<8x384xf32> to vector<8x128xf32>
    %62 = vector.extract_strided_slice %60 {offsets = [0, 0], sizes = [8, 128], strides = [1, 1]} : vector<8x384xf32> to vector<8x128xf32>
    %63 = arith.addf %61, %62 : vector<8x128xf32>
    %64 = arith.negf %63 : vector<8x128xf32>
    %65 = math.exp %64 : vector<8x128xf32>
    %cst_32 = arith.constant 1.000000e+00 : f32
    %66 = vector.broadcast %cst_32 : f32 to vector<8x128xf32>
    %67 = arith.addf %66, %65 : vector<8x128xf32>
    %68 = arith.divf %66, %67 : vector<8x128xf32>
    %69 = vector.extract_strided_slice %55 {offsets = [0, 128], sizes = [8, 128], strides = [1, 1]} : vector<8x384xf32> to vector<8x128xf32>
    %70 = vector.extract_strided_slice %60 {offsets = [0, 128], sizes = [8, 128], strides = [1, 1]} : vector<8x384xf32> to vector<8x128xf32>
    %71 = arith.addf %69, %70 : vector<8x128xf32>
    %72 = arith.negf %71 : vector<8x128xf32>
    %73 = math.exp %72 : vector<8x128xf32>
    %cst_33 = arith.constant 1.000000e+00 : f32
    %74 = vector.broadcast %cst_33 : f32 to vector<8x128xf32>
    %75 = arith.addf %74, %73 : vector<8x128xf32>
    %76 = arith.divf %74, %75 : vector<8x128xf32>
    %77 = vector.extract_strided_slice %55 {offsets = [0, 256], sizes = [8, 128], strides = [1, 1]} : vector<8x384xf32> to vector<8x128xf32>
    %78 = vector.extract_strided_slice %60 {offsets = [0, 256], sizes = [8, 128], strides = [1, 1]} : vector<8x384xf32> to vector<8x128xf32>
    %79 = arith.mulf %68, %78 : vector<8x128xf32>
    %80 = arith.addf %77, %79 : vector<8x128xf32>
    %81 = math.tanh %80 : vector<8x128xf32>
    %cst_34 = arith.constant 1.000000e+00 : f32
    %82 = vector.broadcast %cst_34 : f32 to vector<8x128xf32>
    %83 = arith.subf %82, %76 : vector<8x128xf32>
    %84 = arith.mulf %83, %81 : vector<8x128xf32>
    %85 = arith.mulf %76, %56 : vector<8x128xf32>
    %86 = arith.addf %84, %85 : vector<8x128xf32>
    %c0_35 = arith.constant 0 : index
    %c0_36 = arith.constant 0 : index
    %87 = vector.load %arg9[%c0_35, %c0_36] : memref<8x128xf32, #tpu.memory_space<vmem>>, vector<8x128xf32>
    tpu.vector_store %arg9[%c0_35, %c0_36], %86 {strides = array<i32>} : memref<8x128xf32, #tpu.memory_space<vmem>>, vector<8x128xf32>,
    %88 = arith.index_cast %c1_i32 : i32 to index
    %c0_37 = arith.constant 0 : index
    %c0_38 = arith.constant 0 : index
    %89 = vector.load %arg8[%88, %c0_37, %c0_38] : memref<8x8x128xf32, #tpu.memory_space<vmem>>, vector<1x8x128xf32>
    %90 = vector.shape_cast %89 : vector<1x8x128xf32> to vector<8x128xf32>
    %91 = vector.shape_cast %86 : vector<8x128xf32> to vector<1x8x128xf32>
    tpu.vector_store %arg8[%88, %c0_37, %c0_38], %91 {strides = array<i32>} : memref<8x8x128xf32, #tpu.memory_space<vmem>>, vector<1x8x128xf32>,
    %c2_i32 = arith.constant 2 : i32
    %c8_i32_39 = arith.constant 8 : i32
    %92 = arith.muli %c2_i32, %c8_i32_39 : i32
    %93 = tpu.assume_multiple %92, 8 : i32
    %94 = arith.index_cast %93 : i32 to index
    %c0_40 = arith.constant 0 : index
    %95 = vector.load %arg10[%94, %c0_40] : memref<64x384xf32, #tpu.memory_space<vmem>>, vector<8x384xf32>
    %c0_41 = arith.constant 0 : index
    %c0_42 = arith.constant 0 : index
    %96 = vector.load %arg9[%c0_41, %c0_42] : memref<8x128xf32, #tpu.memory_space<vmem>>, vector<8x128xf32>
    %c0_43 = arith.constant 0 : index
    %c0_44 = arith.constant 0 : index
    %97 = vector.load %arg5[%c0_43, %c0_44] : memref<128x384xf32, #tpu.memory_space<vmem>>, vector<128x384xf32>
    %cst_45 = arith.constant dense<0.000000e+00> : vector<8x384xf32>
    %98 = tpu.matmul %96, %97, %cst_45 {dimension_numbers = #tpu.dot_dimension_numbers<[1], [0], [0], [1], [0, 0, 1, 1], [], []>} : vector<8x128xf32>, vector<128x384xf32>, vector<8x384xf32> -> vector<8x384xf32>
    %99 = vector.broadcast %11 : vector<1x384xf32> to vector<8x384xf32>
    %100 = arith.addf %98, %99 : vector<8x384xf32>
    %101 = vector.extract_strided_slice %95 {offsets = [0, 0], sizes = [8, 128], strides = [1, 1]} : vector<8x384xf32> to vector<8x128xf32>
    %102 = vector.extract_strided_slice %100 {offsets = [0, 0], sizes = [8, 128], strides = [1, 1]} : vector<8x384xf32> to vector<8x128xf32>
    %103 = arith.addf %101, %102 : vector<8x128xf32>
    %104 = arith.negf %103 : vector<8x128xf32>
    %105 = math.exp %104 : vector<8x128xf32>
    %cst_46 = arith.constant 1.000000e+00 : f32
    %106 = vector.broadcast %cst_46 : f32 to vector<8x128xf32>
    %107 = arith.addf %106, %105 : vector<8x128xf32>
    %108 = arith.divf %106, %107 : vector<8x128xf32>
    %109 = vector.extract_strided_slice %95 {offsets = [0, 128], sizes = [8, 128], strides = [1, 1]} : vector<8x384xf32> to vector<8x128xf32>
    %110 = vector.extract_strided_slice %100 {offsets = [0, 128], sizes = [8, 128], strides = [1, 1]} : vector<8x384xf32> to vector<8x128xf32>
    %111 = arith.addf %109, %110 : vector<8x128xf32>
    %112 = arith.negf %111 : vector<8x128xf32>
    %113 = math.exp %112 : vector<8x128xf32>
    %cst_47 = arith.constant 1.000000e+00 : f32
    %114 = vector.broadcast %cst_47 : f32 to vector<8x128xf32>
    %115 = arith.addf %114, %113 : vector<8x128xf32>
    %116 = arith.divf %114, %115 : vector<8x128xf32>
    %117 = vector.extract_strided_slice %95 {offsets = [0, 256], sizes = [8, 128], strides = [1, 1]} : vector<8x384xf32> to vector<8x128xf32>
    %118 = vector.extract_strided_slice %100 {offsets = [0, 256], sizes = [8, 128], strides = [1, 1]} : vector<8x384xf32> to vector<8x128xf32>
    %119 = arith.mulf %108, %118 : vector<8x128xf32>
    %120 = arith.addf %117, %119 : vector<8x128xf32>
    %121 = math.tanh %120 : vector<8x128xf32>
    %cst_48 = arith.constant 1.000000e+00 : f32
    %122 = vector.broadcast %cst_48 : f32 to vector<8x128xf32>
    %123 = arith.subf %122, %116 : vector<8x128xf32>
    %124 = arith.mulf %123, %121 : vector<8x128xf32>
    %125 = arith.mulf %116, %96 : vector<8x128xf32>
    %126 = arith.addf %124, %125 : vector<8x128xf32>
    %c0_49 = arith.constant 0 : index
    %c0_50 = arith.constant 0 : index
    %127 = vector.load %arg9[%c0_49, %c0_50] : memref<8x128xf32, #tpu.memory_space<vmem>>, vector<8x128xf32>
    tpu.vector_store %arg9[%c0_49, %c0_50], %126 {strides = array<i32>} : memref<8x128xf32, #tpu.memory_space<vmem>>, vector<8x128xf32>,
    %128 = arith.index_cast %c2_i32 : i32 to index
    %c0_51 = arith.constant 0 : index
    %c0_52 = arith.constant 0 : index
    %129 = vector.load %arg8[%128, %c0_51, %c0_52] : memref<8x8x128xf32, #tpu.memory_space<vmem>>, vector<1x8x128xf32>
    %130 = vector.shape_cast %129 : vector<1x8x128xf32> to vector<8x128xf32>
    %131 = vector.shape_cast %126 : vector<8x128xf32> to vector<1x8x128xf32>
    tpu.vector_store %arg8[%128, %c0_51, %c0_52], %131 {strides = array<i32>} : memref<8x8x128xf32, #tpu.memory_space<vmem>>, vector<1x8x128xf32>,
    %c3_i32 = arith.constant 3 : i32
    %c8_i32_53 = arith.constant 8 : i32
    %132 = arith.muli %c3_i32, %c8_i32_53 : i32
    %133 = tpu.assume_multiple %132, 8 : i32
    %134 = arith.index_cast %133 : i32 to index
    %c0_54 = arith.constant 0 : index
    %135 = vector.load %arg10[%134, %c0_54] : memref<64x384xf32, #tpu.memory_space<vmem>>, vector<8x384xf32>
    %c0_55 = arith.constant 0 : index
    %c0_56 = arith.constant 0 : index
    %136 = vector.load %arg9[%c0_55, %c0_56] : memref<8x128xf32, #tpu.memory_space<vmem>>, vector<8x128xf32>
    %c0_57 = arith.constant 0 : index
    %c0_58 = arith.constant 0 : index
    %137 = vector.load %arg5[%c0_57, %c0_58] : memref<128x384xf32, #tpu.memory_space<vmem>>, vector<128x384xf32>
    %cst_59 = arith.constant dense<0.000000e+00> : vector<8x384xf32>
    %138 = tpu.matmul %136, %137, %cst_59 {dimension_numbers = #tpu.dot_dimension_numbers<[1], [0], [0], [1], [0, 0, 1, 1], [], []>} : vector<8x128xf32>, vector<128x384xf32>, vector<8x384xf32> -> vector<8x384xf32>
    %139 = vector.broadcast %11 : vector<1x384xf32> to vector<8x384xf32>
    %140 = arith.addf %138, %139 : vector<8x384xf32>
    %141 = vector.extract_strided_slice %135 {offsets = [0, 0], sizes = [8, 128], strides = [1, 1]} : vector<8x384xf32> to vector<8x128xf32>
    %142 = vector.extract_strided_slice %140 {offsets = [0, 0], sizes = [8, 128], strides = [1, 1]} : vector<8x384xf32> to vector<8x128xf32>
    %143 = arith.addf %141, %142 : vector<8x128xf32>
    %144 = arith.negf %143 : vector<8x128xf32>
    %145 = math.exp %144 : vector<8x128xf32>
    %cst_60 = arith.constant 1.000000e+00 : f32
    %146 = vector.broadcast %cst_60 : f32 to vector<8x128xf32>
    %147 = arith.addf %146, %145 : vector<8x128xf32>
    %148 = arith.divf %146, %147 : vector<8x128xf32>
    %149 = vector.extract_strided_slice %135 {offsets = [0, 128], sizes = [8, 128], strides = [1, 1]} : vector<8x384xf32> to vector<8x128xf32>
    %150 = vector.extract_strided_slice %140 {offsets = [0, 128], sizes = [8, 128], strides = [1, 1]} : vector<8x384xf32> to vector<8x128xf32>
    %151 = arith.addf %149, %150 : vector<8x128xf32>
    %152 = arith.negf %151 : vector<8x128xf32>
    %153 = math.exp %152 : vector<8x128xf32>
    %cst_61 = arith.constant 1.000000e+00 : f32
    %154 = vector.broadcast %cst_61 : f32 to vector<8x128xf32>
    %155 = arith.addf %154, %153 : vector<8x128xf32>
    %156 = arith.divf %154, %155 : vector<8x128xf32>
    %157 = vector.extract_strided_slice %135 {offsets = [0, 256], sizes = [8, 128], strides = [1, 1]} : vector<8x384xf32> to vector<8x128xf32>
    %158 = vector.extract_strided_slice %140 {offsets = [0, 256], sizes = [8, 128], strides = [1, 1]} : vector<8x384xf32> to vector<8x128xf32>
    %159 = arith.mulf %148, %158 : vector<8x128xf32>
    %160 = arith.addf %157, %159 : vector<8x128xf32>
    %161 = math.tanh %160 : vector<8x128xf32>
    %cst_62 = arith.constant 1.000000e+00 : f32
    %162 = vector.broadcast %cst_62 : f32 to vector<8x128xf32>
    %163 = arith.subf %162, %156 : vector<8x128xf32>
    %164 = arith.mulf %163, %161 : vector<8x128xf32>
    %165 = arith.mulf %156, %136 : vector<8x128xf32>
    %166 = arith.addf %164, %165 : vector<8x128xf32>
    %c0_63 = arith.constant 0 : index
    %c0_64 = arith.constant 0 : index
    %167 = vector.load %arg9[%c0_63, %c0_64] : memref<8x128xf32, #tpu.memory_space<vmem>>, vector<8x128xf32>
    tpu.vector_store %arg9[%c0_63, %c0_64], %166 {strides = array<i32>} : memref<8x128xf32, #tpu.memory_space<vmem>>, vector<8x128xf32>,
    %168 = arith.index_cast %c3_i32 : i32 to index
    %c0_65 = arith.constant 0 : index
    %c0_66 = arith.constant 0 : index
    %169 = vector.load %arg8[%168, %c0_65, %c0_66] : memref<8x8x128xf32, #tpu.memory_space<vmem>>, vector<1x8x128xf32>
    %170 = vector.shape_cast %169 : vector<1x8x128xf32> to vector<8x128xf32>
    %171 = vector.shape_cast %166 : vector<8x128xf32> to vector<1x8x128xf32>
    tpu.vector_store %arg8[%168, %c0_65, %c0_66], %171 {strides = array<i32>} : memref<8x8x128xf32, #tpu.memory_space<vmem>>, vector<1x8x128xf32>,
    %c4_i32 = arith.constant 4 : i32
    %c8_i32_67 = arith.constant 8 : i32
    %172 = arith.muli %c4_i32, %c8_i32_67 : i32
    %173 = tpu.assume_multiple %172, 8 : i32
    %174 = arith.index_cast %173 : i32 to index
    %c0_68 = arith.constant 0 : index
    %175 = vector.load %arg10[%174, %c0_68] : memref<64x384xf32, #tpu.memory_space<vmem>>, vector<8x384xf32>
    %c0_69 = arith.constant 0 : index
    %c0_70 = arith.constant 0 : index
    %176 = vector.load %arg9[%c0_69, %c0_70] : memref<8x128xf32, #tpu.memory_space<vmem>>, vector<8x128xf32>
    %c0_71 = arith.constant 0 : index
    %c0_72 = arith.constant 0 : index
    %177 = vector.load %arg5[%c0_71, %c0_72] : memref<128x384xf32, #tpu.memory_space<vmem>>, vector<128x384xf32>
    %cst_73 = arith.constant dense<0.000000e+00> : vector<8x384xf32>
    %178 = tpu.matmul %176, %177, %cst_73 {dimension_numbers = #tpu.dot_dimension_numbers<[1], [0], [0], [1], [0, 0, 1, 1], [], []>} : vector<8x128xf32>, vector<128x384xf32>, vector<8x384xf32> -> vector<8x384xf32>
    %179 = vector.broadcast %11 : vector<1x384xf32> to vector<8x384xf32>
    %180 = arith.addf %178, %179 : vector<8x384xf32>
    %181 = vector.extract_strided_slice %175 {offsets = [0, 0], sizes = [8, 128], strides = [1, 1]} : vector<8x384xf32> to vector<8x128xf32>
    %182 = vector.extract_strided_slice %180 {offsets = [0, 0], sizes = [8, 128], strides = [1, 1]} : vector<8x384xf32> to vector<8x128xf32>
    %183 = arith.addf %181, %182 : vector<8x128xf32>
    %184 = arith.negf %183 : vector<8x128xf32>
    %185 = math.exp %184 : vector<8x128xf32>
    %cst_74 = arith.constant 1.000000e+00 : f32
    %186 = vector.broadcast %cst_74 : f32 to vector<8x128xf32>
    %187 = arith.addf %186, %185 : vector<8x128xf32>
    %188 = arith.divf %186, %187 : vector<8x128xf32>
    %189 = vector.extract_strided_slice %175 {offsets = [0, 128], sizes = [8, 128], strides = [1, 1]} : vector<8x384xf32> to vector<8x128xf32>
    %190 = vector.extract_strided_slice %180 {offsets = [0, 128], sizes = [8, 128], strides = [1, 1]} : vector<8x384xf32> to vector<8x128xf32>
    %191 = arith.addf %189, %190 : vector<8x128xf32>
    %192 = arith.negf %191 : vector<8x128xf32>
    %193 = math.exp %192 : vector<8x128xf32>
    %cst_75 = arith.constant 1.000000e+00 : f32
    %194 = vector.broadcast %cst_75 : f32 to vector<8x128xf32>
    %195 = arith.addf %194, %193 : vector<8x128xf32>
    %196 = arith.divf %194, %195 : vector<8x128xf32>
    %197 = vector.extract_strided_slice %175 {offsets = [0, 256], sizes = [8, 128], strides = [1, 1]} : vector<8x384xf32> to vector<8x128xf32>
    %198 = vector.extract_strided_slice %180 {offsets = [0, 256], sizes = [8, 128], strides = [1, 1]} : vector<8x384xf32> to vector<8x128xf32>
    %199 = arith.mulf %188, %198 : vector<8x128xf32>
    %200 = arith.addf %197, %199 : vector<8x128xf32>
    %201 = math.tanh %200 : vector<8x128xf32>
    %cst_76 = arith.constant 1.000000e+00 : f32
    %202 = vector.broadcast %cst_76 : f32 to vector<8x128xf32>
    %203 = arith.subf %202, %196 : vector<8x128xf32>
    %204 = arith.mulf %203, %201 : vector<8x128xf32>
    %205 = arith.mulf %196, %176 : vector<8x128xf32>
    %206 = arith.addf %204, %205 : vector<8x128xf32>
    %c0_77 = arith.constant 0 : index
    %c0_78 = arith.constant 0 : index
    %207 = vector.load %arg9[%c0_77, %c0_78] : memref<8x128xf32, #tpu.memory_space<vmem>>, vector<8x128xf32>
    tpu.vector_store %arg9[%c0_77, %c0_78], %206 {strides = array<i32>} : memref<8x128xf32, #tpu.memory_space<vmem>>, vector<8x128xf32>,
    %208 = arith.index_cast %c4_i32 : i32 to index
    %c0_79 = arith.constant 0 : index
    %c0_80 = arith.constant 0 : index
    %209 = vector.load %arg8[%208, %c0_79, %c0_80] : memref<8x8x128xf32, #tpu.memory_space<vmem>>, vector<1x8x128xf32>
    %210 = vector.shape_cast %209 : vector<1x8x128xf32> to vector<8x128xf32>
    %211 = vector.shape_cast %206 : vector<8x128xf32> to vector<1x8x128xf32>
    tpu.vector_store %arg8[%208, %c0_79, %c0_80], %211 {strides = array<i32>} : memref<8x8x128xf32, #tpu.memory_space<vmem>>, vector<1x8x128xf32>,
    %c5_i32 = arith.constant 5 : i32
    %c8_i32_81 = arith.constant 8 : i32
    %212 = arith.muli %c5_i32, %c8_i32_81 : i32
    %213 = tpu.assume_multiple %212, 8 : i32
    %214 = arith.index_cast %213 : i32 to index
    %c0_82 = arith.constant 0 : index
    %215 = vector.load %arg10[%214, %c0_82] : memref<64x384xf32, #tpu.memory_space<vmem>>, vector<8x384xf32>
    %c0_83 = arith.constant 0 : index
    %c0_84 = arith.constant 0 : index
    %216 = vector.load %arg9[%c0_83, %c0_84] : memref<8x128xf32, #tpu.memory_space<vmem>>, vector<8x128xf32>
    %c0_85 = arith.constant 0 : index
    %c0_86 = arith.constant 0 : index
    %217 = vector.load %arg5[%c0_85, %c0_86] : memref<128x384xf32, #tpu.memory_space<vmem>>, vector<128x384xf32>
    %cst_87 = arith.constant dense<0.000000e+00> : vector<8x384xf32>
    %218 = tpu.matmul %216, %217, %cst_87 {dimension_numbers = #tpu.dot_dimension_numbers<[1], [0], [0], [1], [0, 0, 1, 1], [], []>} : vector<8x128xf32>, vector<128x384xf32>, vector<8x384xf32> -> vector<8x384xf32>
    %219 = vector.broadcast %11 : vector<1x384xf32> to vector<8x384xf32>
    %220 = arith.addf %218, %219 : vector<8x384xf32>
    %221 = vector.extract_strided_slice %215 {offsets = [0, 0], sizes = [8, 128], strides = [1, 1]} : vector<8x384xf32> to vector<8x128xf32>
    %222 = vector.extract_strided_slice %220 {offsets = [0, 0], sizes = [8, 128], strides = [1, 1]} : vector<8x384xf32> to vector<8x128xf32>
    %223 = arith.addf %221, %222 : vector<8x128xf32>
    %224 = arith.negf %223 : vector<8x128xf32>
    %225 = math.exp %224 : vector<8x128xf32>
    %cst_88 = arith.constant 1.000000e+00 : f32
    %226 = vector.broadcast %cst_88 : f32 to vector<8x128xf32>
    %227 = arith.addf %226, %225 : vector<8x128xf32>
    %228 = arith.divf %226, %227 : vector<8x128xf32>
    %229 = vector.extract_strided_slice %215 {offsets = [0, 128], sizes = [8, 128], strides = [1, 1]} : vector<8x384xf32> to vector<8x128xf32>
    %230 = vector.extract_strided_slice %220 {offsets = [0, 128], sizes = [8, 128], strides = [1, 1]} : vector<8x384xf32> to vector<8x128xf32>
    %231 = arith.addf %229, %230 : vector<8x128xf32>
    %232 = arith.negf %231 : vector<8x128xf32>
    %233 = math.exp %232 : vector<8x128xf32>
    %cst_89 = arith.constant 1.000000e+00 : f32
    %234 = vector.broadcast %cst_89 : f32 to vector<8x128xf32>
    %235 = arith.addf %234, %233 : vector<8x128xf32>
    %236 = arith.divf %234, %235 : vector<8x128xf32>
    %237 = vector.extract_strided_slice %215 {offsets = [0, 256], sizes = [8, 128], strides = [1, 1]} : vector<8x384xf32> to vector<8x128xf32>
    %238 = vector.extract_strided_slice %220 {offsets = [0, 256], sizes = [8, 128], strides = [1, 1]} : vector<8x384xf32> to vector<8x128xf32>
    %239 = arith.mulf %228, %238 : vector<8x128xf32>
    %240 = arith.addf %237, %239 : vector<8x128xf32>
    %241 = math.tanh %240 : vector<8x128xf32>
    %cst_90 = arith.constant 1.000000e+00 : f32
    %242 = vector.broadcast %cst_90 : f32 to vector<8x128xf32>
    %243 = arith.subf %242, %236 : vector<8x128xf32>
    %244 = arith.mulf %243, %241 : vector<8x128xf32>
    %245 = arith.mulf %236, %216 : vector<8x128xf32>
    %246 = arith.addf %244, %245 : vector<8x128xf32>
    %c0_91 = arith.constant 0 : index
    %c0_92 = arith.constant 0 : index
    %247 = vector.load %arg9[%c0_91, %c0_92] : memref<8x128xf32, #tpu.memory_space<vmem>>, vector<8x128xf32>
    tpu.vector_store %arg9[%c0_91, %c0_92], %246 {strides = array<i32>} : memref<8x128xf32, #tpu.memory_space<vmem>>, vector<8x128xf32>,
    %248 = arith.index_cast %c5_i32 : i32 to index
    %c0_93 = arith.constant 0 : index
    %c0_94 = arith.constant 0 : index
    %249 = vector.load %arg8[%248, %c0_93, %c0_94] : memref<8x8x128xf32, #tpu.memory_space<vmem>>, vector<1x8x128xf32>
    %250 = vector.shape_cast %249 : vector<1x8x128xf32> to vector<8x128xf32>
    %251 = vector.shape_cast %246 : vector<8x128xf32> to vector<1x8x128xf32>
    tpu.vector_store %arg8[%248, %c0_93, %c0_94], %251 {strides = array<i32>} : memref<8x8x128xf32, #tpu.memory_space<vmem>>, vector<1x8x128xf32>,
    %c6_i32 = arith.constant 6 : i32
    %c8_i32_95 = arith.constant 8 : i32
    %252 = arith.muli %c6_i32, %c8_i32_95 : i32
    %253 = tpu.assume_multiple %252, 8 : i32
    %254 = arith.index_cast %253 : i32 to index
    %c0_96 = arith.constant 0 : index
    %255 = vector.load %arg10[%254, %c0_96] : memref<64x384xf32, #tpu.memory_space<vmem>>, vector<8x384xf32>
    %c0_97 = arith.constant 0 : index
    %c0_98 = arith.constant 0 : index
    %256 = vector.load %arg9[%c0_97, %c0_98] : memref<8x128xf32, #tpu.memory_space<vmem>>, vector<8x128xf32>
    %c0_99 = arith.constant 0 : index
    %c0_100 = arith.constant 0 : index
    %257 = vector.load %arg5[%c0_99, %c0_100] : memref<128x384xf32, #tpu.memory_space<vmem>>, vector<128x384xf32>
    %cst_101 = arith.constant dense<0.000000e+00> : vector<8x384xf32>
    %258 = tpu.matmul %256, %257, %cst_101 {dimension_numbers = #tpu.dot_dimension_numbers<[1], [0], [0], [1], [0, 0, 1, 1], [], []>} : vector<8x128xf32>, vector<128x384xf32>, vector<8x384xf32> -> vector<8x384xf32>
    %259 = vector.broadcast %11 : vector<1x384xf32> to vector<8x384xf32>
    %260 = arith.addf %258, %259 : vector<8x384xf32>
    %261 = vector.extract_strided_slice %255 {offsets = [0, 0], sizes = [8, 128], strides = [1, 1]} : vector<8x384xf32> to vector<8x128xf32>
    %262 = vector.extract_strided_slice %260 {offsets = [0, 0], sizes = [8, 128], strides = [1, 1]} : vector<8x384xf32> to vector<8x128xf32>
    %263 = arith.addf %261, %262 : vector<8x128xf32>
    %264 = arith.negf %263 : vector<8x128xf32>
    %265 = math.exp %264 : vector<8x128xf32>
    %cst_102 = arith.constant 1.000000e+00 : f32
    %266 = vector.broadcast %cst_102 : f32 to vector<8x128xf32>
    %267 = arith.addf %266, %265 : vector<8x128xf32>
    %268 = arith.divf %266, %267 : vector<8x128xf32>
    %269 = vector.extract_strided_slice %255 {offsets = [0, 128], sizes = [8, 128], strides = [1, 1]} : vector<8x384xf32> to vector<8x128xf32>
    %270 = vector.extract_strided_slice %260 {offsets = [0, 128], sizes = [8, 128], strides = [1, 1]} : vector<8x384xf32> to vector<8x128xf32>
    %271 = arith.addf %269, %270 : vector<8x128xf32>
    %272 = arith.negf %271 : vector<8x128xf32>
    %273 = math.exp %272 : vector<8x128xf32>
    %cst_103 = arith.constant 1.000000e+00 : f32
    %274 = vector.broadcast %cst_103 : f32 to vector<8x128xf32>
    %275 = arith.addf %274, %273 : vector<8x128xf32>
    %276 = arith.divf %274, %275 : vector<8x128xf32>
    %277 = vector.extract_strided_slice %255 {offsets = [0, 256], sizes = [8, 128], strides = [1, 1]} : vector<8x384xf32> to vector<8x128xf32>
    %278 = vector.extract_strided_slice %260 {offsets = [0, 256], sizes = [8, 128], strides = [1, 1]} : vector<8x384xf32> to vector<8x128xf32>
    %279 = arith.mulf %268, %278 : vector<8x128xf32>
    %280 = arith.addf %277, %279 : vector<8x128xf32>
    %281 = math.tanh %280 : vector<8x128xf32>
    %cst_104 = arith.constant 1.000000e+00 : f32
    %282 = vector.broadcast %cst_104 : f32 to vector<8x128xf32>
    %283 = arith.subf %282, %276 : vector<8x128xf32>
    %284 = arith.mulf %283, %281 : vector<8x128xf32>
    %285 = arith.mulf %276, %256 : vector<8x128xf32>
    %286 = arith.addf %284, %285 : vector<8x128xf32>
    %c0_105 = arith.constant 0 : index
    %c0_106 = arith.constant 0 : index
    %287 = vector.load %arg9[%c0_105, %c0_106] : memref<8x128xf32, #tpu.memory_space<vmem>>, vector<8x128xf32>
    tpu.vector_store %arg9[%c0_105, %c0_106], %286 {strides = array<i32>} : memref<8x128xf32, #tpu.memory_space<vmem>>, vector<8x128xf32>,
    %288 = arith.index_cast %c6_i32 : i32 to index
    %c0_107 = arith.constant 0 : index
    %c0_108 = arith.constant 0 : index
    %289 = vector.load %arg8[%288, %c0_107, %c0_108] : memref<8x8x128xf32, #tpu.memory_space<vmem>>, vector<1x8x128xf32>
    %290 = vector.shape_cast %289 : vector<1x8x128xf32> to vector<8x128xf32>
    %291 = vector.shape_cast %286 : vector<8x128xf32> to vector<1x8x128xf32>
    tpu.vector_store %arg8[%288, %c0_107, %c0_108], %291 {strides = array<i32>} : memref<8x8x128xf32, #tpu.memory_space<vmem>>, vector<1x8x128xf32>,
    %c7_i32 = arith.constant 7 : i32
    %c8_i32_109 = arith.constant 8 : i32
    %292 = arith.muli %c7_i32, %c8_i32_109 : i32
    %293 = tpu.assume_multiple %292, 8 : i32
    %294 = arith.index_cast %293 : i32 to index
    %c0_110 = arith.constant 0 : index
    %295 = vector.load %arg10[%294, %c0_110] : memref<64x384xf32, #tpu.memory_space<vmem>>, vector<8x384xf32>
    %c0_111 = arith.constant 0 : index
    %c0_112 = arith.constant 0 : index
    %296 = vector.load %arg9[%c0_111, %c0_112] : memref<8x128xf32, #tpu.memory_space<vmem>>, vector<8x128xf32>
    %c0_113 = arith.constant 0 : index
    %c0_114 = arith.constant 0 : index
    %297 = vector.load %arg5[%c0_113, %c0_114] : memref<128x384xf32, #tpu.memory_space<vmem>>, vector<128x384xf32>
    %cst_115 = arith.constant dense<0.000000e+00> : vector<8x384xf32>
    %298 = tpu.matmul %296, %297, %cst_115 {dimension_numbers = #tpu.dot_dimension_numbers<[1], [0], [0], [1], [0, 0, 1, 1], [], []>} : vector<8x128xf32>, vector<128x384xf32>, vector<8x384xf32> -> vector<8x384xf32>
    %299 = vector.broadcast %11 : vector<1x384xf32> to vector<8x384xf32>
    %300 = arith.addf %298, %299 : vector<8x384xf32>
    %301 = vector.extract_strided_slice %295 {offsets = [0, 0], sizes = [8, 128], strides = [1, 1]} : vector<8x384xf32> to vector<8x128xf32>
    %302 = vector.extract_strided_slice %300 {offsets = [0, 0], sizes = [8, 128], strides = [1, 1]} : vector<8x384xf32> to vector<8x128xf32>
    %303 = arith.addf %301, %302 : vector<8x128xf32>
    %304 = arith.negf %303 : vector<8x128xf32>
    %305 = math.exp %304 : vector<8x128xf32>
    %cst_116 = arith.constant 1.000000e+00 : f32
    %306 = vector.broadcast %cst_116 : f32 to vector<8x128xf32>
    %307 = arith.addf %306, %305 : vector<8x128xf32>
    %308 = arith.divf %306, %307 : vector<8x128xf32>
    %309 = vector.extract_strided_slice %295 {offsets = [0, 128], sizes = [8, 128], strides = [1, 1]} : vector<8x384xf32> to vector<8x128xf32>
    %310 = vector.extract_strided_slice %300 {offsets = [0, 128], sizes = [8, 128], strides = [1, 1]} : vector<8x384xf32> to vector<8x128xf32>
    %311 = arith.addf %309, %310 : vector<8x128xf32>
    %312 = arith.negf %311 : vector<8x128xf32>
    %313 = math.exp %312 : vector<8x128xf32>
    %cst_117 = arith.constant 1.000000e+00 : f32
    %314 = vector.broadcast %cst_117 : f32 to vector<8x128xf32>
    %315 = arith.addf %314, %313 : vector<8x128xf32>
    %316 = arith.divf %314, %315 : vector<8x128xf32>
    %317 = vector.extract_strided_slice %295 {offsets = [0, 256], sizes = [8, 128], strides = [1, 1]} : vector<8x384xf32> to vector<8x128xf32>
    %318 = vector.extract_strided_slice %300 {offsets = [0, 256], sizes = [8, 128], strides = [1, 1]} : vector<8x384xf32> to vector<8x128xf32>
    %319 = arith.mulf %308, %318 : vector<8x128xf32>
    %320 = arith.addf %317, %319 : vector<8x128xf32>
    %321 = math.tanh %320 : vector<8x128xf32>
    %cst_118 = arith.constant 1.000000e+00 : f32
    %322 = vector.broadcast %cst_118 : f32 to vector<8x128xf32>
    %323 = arith.subf %322, %316 : vector<8x128xf32>
    %324 = arith.mulf %323, %321 : vector<8x128xf32>
    %325 = arith.mulf %316, %296 : vector<8x128xf32>
    %326 = arith.addf %324, %325 : vector<8x128xf32>
    %c0_119 = arith.constant 0 : index
    %c0_120 = arith.constant 0 : index
    %327 = vector.load %arg9[%c0_119, %c0_120] : memref<8x128xf32, #tpu.memory_space<vmem>>, vector<8x128xf32>
    tpu.vector_store %arg9[%c0_119, %c0_120], %326 {strides = array<i32>} : memref<8x128xf32, #tpu.memory_space<vmem>>, vector<8x128xf32>,
    %328 = arith.index_cast %c7_i32 : i32 to index
    %c0_121 = arith.constant 0 : index
    %c0_122 = arith.constant 0 : index
    %329 = vector.load %arg8[%328, %c0_121, %c0_122] : memref<8x8x128xf32, #tpu.memory_space<vmem>>, vector<1x8x128xf32>
    %330 = vector.shape_cast %329 : vector<1x8x128xf32> to vector<8x128xf32>
    %331 = vector.shape_cast %326 : vector<8x128xf32> to vector<1x8x128xf32>
    tpu.vector_store %arg8[%328, %c0_121, %c0_122], %331 {strides = array<i32>} : memref<8x8x128xf32, #tpu.memory_space<vmem>>, vector<1x8x128xf32>,
    %c8_i32_123 = arith.constant 8 : i32
    return
  }
  func.func @transform_0(%arg0: i32, %arg1: i32) -> (i32, i32, i32) {
    %c0_i32 = arith.constant 0 : i32
    %c0_i32_0 = arith.constant 0 : i32
    return %arg1, %arg0, %c0_i32 : i32, i32, i32
  }
  func.func @transform_1(%arg0: i32, %arg1: i32) -> (i32, i32) {
    %c0_i32 = arith.constant 0 : i32
    %c0_i32_0 = arith.constant 0 : i32
    return %arg0, %c0_i32 : i32, i32
  }
  func.func @transform_2(%arg0: i32, %arg1: i32) -> (i32, i32) {
    %c0_i32 = arith.constant 0 : i32
    %c0_i32_0 = arith.constant 0 : i32
    %c0_i32_1 = arith.constant 0 : i32
    return %c0_i32, %c0_i32_0 : i32, i32
  }
  func.func @transform_3(%arg0: i32, %arg1: i32) -> (i32, i32) {
    %c0_i32 = arith.constant 0 : i32
    %c0_i32_0 = arith.constant 0 : i32
    %c0_i32_1 = arith.constant 0 : i32
    return %c0_i32, %c0_i32_0 : i32, i32
  }
  func.func @transform_4(%arg0: i32, %arg1: i32) -> (i32, i32) {
    %c0_i32 = arith.constant 0 : i32
    %c0_i32_0 = arith.constant 0 : i32
    %c0_i32_1 = arith.constant 0 : i32
    return %c0_i32, %c0_i32_0 : i32, i32
  }
  func.func @transform_5(%arg0: i32, %arg1: i32) -> (i32, i32) {
    %c0_i32 = arith.constant 0 : i32
    %c0_i32_0 = arith.constant 0 : i32
    %c0_i32_1 = arith.constant 0 : i32
    return %c0_i32, %c0_i32_0 : i32, i32
  }
  func.func @transform_6(%arg0: i32, %arg1: i32) -> (i32, i32, i32) {
    %c0_i32 = arith.constant 0 : i32
    %c0_i32_0 = arith.constant 0 : i32
    return %arg1, %arg0, %c0_i32 : i32, i32, i32
  }
}

</mosaic_0001>

<bundles_post_ra>
// kernel: cor_grunet_forward.2
= control target key start
LH: loop header
LB: loop body
LE: loop exit
PB: predicated region body
PF: predicated region fallthrough
CT: control target
= control target key end

     0   :  { %v3281_v3 = vmov 0.0   ;;  %vm3283_vm0 = vmmov 0   ;;  %s4276_s2 = inlined_call_operand.vmem [shape: f32[128,384], index: 2, kind: input, shape index: {}]   ;;  %s4277_s0 = inlined_call_operand.vmem [shape: f32[8,8,128], index: 0, kind: input, shape index: {}]   ;;  %s4278_s3 = inlined_call_operand.vmem [shape: f32[128,384], index: 3, kind: input, shape index: {}]   ;;  %s4279_s1 = inlined_call_operand.vmem [shape: f32[8,128], index: 1, kind: input, shape index: {}]   ;;  %s4280_s4 = inlined_call_operand.vmem [shape: f32[1,384], index: 4, kind: input, shape index: {}]   ;;  %s4281_s5 = inlined_call_operand.vmem [shape: f32[1,384], index: 5, kind: input, shape index: {}]   ;;  %s4282_s6 = inlined_call_operand.vmem [shape: f32[8,8,128], index: 6, kind: output, shape index: {}]  }
   0x1   :  { %v38_v0 = vld [vmem:[%s4276_s2 + $0x8] sm:$0xff]  ;;  %v41_v1 = vld [vmem:[%s4276_s2 + $0x20] sm:$0xff]  ;;  %166 = vmatprep.mubr.f32.mxu0 %v3281_v3  ;;  %v40_v5 = vld [vmem:[%s4276_s2 + $0x18] sm:$0xff] }
   0x2   :  { %v37_v2 = vld [vmem:[%s4276_s2] sm:$0xff]  ;;  %v2638_v4 = vpack.c.bf16 %v41_v1, %v38_v0  ;;  %v44_v6 = vld [vmem:[%s4276_s2 + $0x38] sm:$0xff]  ;;  %v47_v7 = vld [vmem:[%s4276_s2 + $0x50] sm:$0xff] }
   0x3   :  { %v2640_v8 = vpack.c.bf16 %v40_v5, %v37_v2  ;;  %v2642_v9 = vpack.c.bf16 %v47_v7, %v44_v6  ;;  %v43_v10 = vld [vmem:[%s4276_s2 + $0x30] sm:$0xff]  ;;  %v46_v11 = vld [vmem:[%s4276_s2 + $0x48] sm:$0xff]  ;;  %v53_v13 = vld [vmem:[%s4276_s2 + $0x80] sm:$0xff] }
   0x4   :  { %v50_v12 = vld [vmem:[%s4276_s2 + $0x68] sm:$0xff]  ;;  %2639 = vmatprep.subr.bf16.mxu0 %v2638_v4  ;;  %v2644_v14 = vpack.c.bf16 %v46_v11, %v43_v10  ;;  %v49_v16 = vld [vmem:[%s4276_s2 + $0x60] sm:$0xff]  ;;  %v52_v17 = vld [vmem:[%s4276_s2 + $0x78] sm:$0xff] }
   0x5   :  { %2641 = vmatpush1.bf16.msra.mxu0 %v2640_v8  ;;  %v2646_v15 = vpack.c.bf16 %v53_v13, %v50_v12  ;;  %v56_v18 = vld [vmem:[%s4276_s2 + $0x98] sm:$0xff]  ;;  %v59_v19 = vld [vmem:[%s4276_s2 + $0xb0] sm:$0xff]  ;;  %v2648_v20 = vpack.c.bf16 %v52_v17, %v49_v16  ;;  %v58_v23 = vld [vmem:[%s4276_s2 + $0xa8] sm:$0xff] }
   0x6   :  { %2643 = vmatprep.subr.bf16.mxu0 %v2642_v9  ;;  %v55_v21 = vld [vmem:[%s4276_s2 + $0x90] sm:$0xff]  ;;  %v2650_v22 = vpack.c.bf16 %v59_v19, %v56_v18  ;;  %v42_v25 = vld [vmem:[%s4276_s2 + $0x28] sm:$0xff]  ;;  %v65_v27 = vld [vmem:[%s4276_s2 + $0xe0] sm:$0xff] }
   0x7   :  { %v39_v24 = vld [vmem:[%s4276_s2 + $0x10] sm:$0xff]  ;;  %v62_v26 = vld [vmem:[%s4276_s2 + $0xc8] sm:$0xff]  ;;  %v45_v29 = vld [vmem:[%s4276_s2 + $0x40] sm:$0xff]  ;;  %v2652_v31 = vpack.c.bf16 %v58_v23, %v55_v21 }
   0x8   :  { %v2670_v28 = vpack.c.bf16 %v42_v25, %v39_v24  ;;  %v48_v30 = vld [vmem:[%s4276_s2 + $0x58] sm:$0xff]  ;;  %v61_v32 = vld [vmem:[%s4276_s2 + $0xc0] sm:$0xff]  ;;  %v2654_v34 = vpack.c.bf16 %v65_v27, %v62_v26  ;;  %v51_v37 = vld [vmem:[%s4276_s2 + $0x70] sm:$0xff] }
   0x9   :  { %2645 = vmatpush1.bf16.msra.mxu0 %v2644_v14  ;;  %v2674_v33 = vpack.c.bf16 %v48_v30, %v45_v29  ;;  %v64_v35 = vld [vmem:[%s4276_s2 + $0xd8] sm:$0xff]  ;;  %v3395_v36 = vld [vmem:[%s4277_s0] sm:$0xff]  ;;  %v71_v39 = vld [vmem:[%s4276_s2 + $0x110] sm:$0xff] }
   0xa   :  { %2647 = vmatprep.subr.bf16.mxu0 %v2646_v15  ;;  %2671 = vmatprep.subr.bf16.mxu1 %v2670_v28  ;;  %v68_v38 = vld [vmem:[%s4276_s2 + $0xf8] sm:$0xff]  ;;  %v54_v40 = vld [vmem:[%s4276_s2 + $0x88] sm:$0xff]  ;;  %v2656_v42 = vpack.c.bf16 %v64_v35, %v61_v32  ;;  %v57_v43 = vld [vmem:[%s4276_s2 + $0xa0] sm:$0xff] }
   0xb   :  { %2673 = vmatpush3.bf16.msra.mxu1 %v2670_v28  ;;  %2346 = vmatprep.mubr.f32.mxu1 %v3395_v36  ;;  %v2678_v41 = vpack.c.bf16 %v54_v40, %v51_v37  ;;  %v60_v44 = vld [vmem:[%s4276_s2 + $0xb8] sm:$0xff]  ;;  %v2658_v45 = vpack.c.bf16 %v71_v39, %v68_v38  ;;  %v67_v46 = vld [vmem:[%s4276_s2 + $0xf0] sm:$0xff]  ;;  %v70_v47 = vld [vmem:[%s4276_s2 + $0x108] sm:$0xff]  ;;  %v3282_v40 = vmov 0.0|0.0  }
   0xc   :  { %2675 = vmatprep.subr.bf16.mxu1 %v2674_v33  ;;  %v74_v48 = vld [vmem:[%s4276_s2 + $0x128] sm:$0xff]  ;;  %v77_v49 = vld [vmem:[%s4276_s2 + $0x140] sm:$0xff]  ;;  %v2682_v50 = vpack.c.bf16 %v60_v44, %v57_v43  ;;  %v63_v51 = vld [vmem:[%s4276_s2 + $0xd0] sm:$0xff]  ;;  %v2660_v53 = vpack.c.bf16 %v70_v47, %v67_v46 }
   0xd   :  { %2649 = vmatpush1.bf16.msra.mxu0 %v2648_v20  ;;  %v66_v52 = vld [vmem:[%s4276_s2 + $0xe8] sm:$0xff]  ;;  %v2662_v54 = vpack.c.bf16 %v77_v49, %v74_v48  ;;  %v73_v55 = vld [vmem:[%s4276_s2 + $0x120] sm:$0xff]  ;;  %v76_v56 = vld [vmem:[%s4276_s2 + $0x138] sm:$0xff] }
   0xe   :  { %2651 = vmatprep.subr.bf16.mxu0 %v2650_v22  ;;  %v80_v57 = vld [vmem:[%s4276_s2 + $0x158] sm:$0xff]  ;;  %v83_v58 = vld [vmem:[%s4276_s2 + $0x170] sm:$0xff]  ;;  %v2686_v59 = vpack.c.bf16 %v66_v52, %v63_v51  ;;  %v69_v60 = vld [vmem:[%s4276_s2 + $0x100] sm:$0xff]  ;;  %v2664_v62 = vpack.c.bf16 %v76_v56, %v73_v55 }
   0xf   :  { %2677 = vmatpush3.bf16.msra.mxu1 %v2674_v33  ;;  %v72_v61 = vld [vmem:[%s4276_s2 + $0x118] sm:$0xff]  ;;  %v2666_v63 = vpack.c.bf16 %v83_v58, %v80_v57  ;;  %v79_v0 = vld [vmem:[%s4276_s2 + $0x150] sm:$0xff]  ;;  %v82_v1 = vld [vmem:[%s4276_s2 + $0x168] sm:$0xff] }
  0x10   :  { %2679 = vmatprep.subr.bf16.mxu1 %v2678_v41  ;;  %v353_v2 = vld [vmem:[%s4278_s3 + $0x8] sm:$0xff]  ;;  %v356_v4 = vld [vmem:[%s4278_s3 + $0x20] sm:$0xff]  ;;  %v2690_v5 = vpack.c.bf16 %v72_v61, %v69_v60  ;;  %v75_v6 = vld [vmem:[%s4276_s2 + $0x130] sm:$0xff]  ;;  %v2668_v8 = vpack.c.bf16 %v82_v1, %v79_v0 }
  0x11   :  { %2653 = vmatpush1.bf16.msra.mxu0 %v2652_v31  ;;  %v78_v7 = vld [vmem:[%s4276_s2 + $0x148] sm:$0xff]  ;;  %v3470_v9 = vpack.c.bf16 %v356_v4, %v353_v2  ;;  %v352_v10 = vld [vmem:[%s4278_s3] sm:$0xff]  ;;  %v355_v11 = vld [vmem:[%s4278_s3 + $0x18] sm:$0xff] }
  0x12   :  { %2655 = vmatprep.subr.bf16.mxu0 %v2654_v34  ;;  %v359_v12 = vld [vmem:[%s4278_s3 + $0x38] sm:$0xff]  ;;  %v362_v13 = vld [vmem:[%s4278_s3 + $0x50] sm:$0xff]  ;;  %v2694_v14 = vpack.c.bf16 %v78_v7, %v75_v6  ;;  %v81_v15 = vld [vmem:[%s4276_s2 + $0x160] sm:$0xff]  ;;  %v3490_v17 = vpack.c.bf16 %v355_v11, %v352_v10 }
  0x13   :  { %2681 = vmatpush3.bf16.msra.mxu1 %v2678_v41  ;;  %v84_v16 = vld [vmem:[%s4276_s2 + $0x178] sm:$0xff]  ;;  %v3493_v18 = vpack.c.bf16 %v362_v13, %v359_v12  ;;  %v358_v19 = vld [vmem:[%s4278_s3 + $0x30] sm:$0xff]  ;;  %v361_v20 = vld [vmem:[%s4278_s3 + $0x48] sm:$0xff] }
  0x14   :  { %2683 = vmatprep.subr.bf16.mxu1 %v2682_v50  ;;  %v365_v21 = vld [vmem:[%s4278_s3 + $0x68] sm:$0xff]  ;;  %v368_v22 = vld [vmem:[%s4278_s3 + $0x80] sm:$0xff]  ;;  %v2698_v23 = vpack.c.bf16 %v84_v16, %v81_v15  ;;  %v3513_v25 = vpack.c.bf16 %v361_v20, %v358_v19  ;;  %v367_v28 = vld [vmem:[%s4278_s3 + $0x78] sm:$0xff] }
  0x15   :  { %2657 = vmatpush1.bf16.msra.mxu0 %v2656_v42  ;;  %v30_v24 = vld [vmem:[%s4277_s0 + $0x8] sm:$0xff]  ;;  %v3516_v26 = vpack.c.bf16 %v368_v22, %v365_v21  ;;  %v364_v27 = vld [vmem:[%s4278_s3 + $0x60] sm:$0xff]  ;;  %v371_v29 = vld [vmem:[%s4278_s3 + $0x98] sm:$0xff] }
  0x16   :  { %2659 = vmatprep.subr.bf16.mxu0 %v2658_v45  ;;  %v374_v30 = vld [vmem:[%s4278_s3 + $0xb0] sm:$0xff]  ;;  %v357_v32 = vld [vmem:[%s4278_s3 + $0x28] sm:$0xff]  ;;  %v3541_v34 = vpack.c.bf16 %v367_v28, %v364_v27  ;;  %v380_v39 = vld [vmem:[%s4278_s3 + $0xe0] sm:$0xff] }
  0x17   :  { %2685 = vmatpush3.bf16.msra.mxu1 %v2682_v50  ;;  %v354_v31 = vld [vmem:[%s4278_s3 + $0x10] sm:$0xff]  ;;  %v3544_v35 = vpack.c.bf16 %v374_v30, %v371_v29  ;;  %v373_v37 = vld [vmem:[%s4278_s3 + $0xa8] sm:$0xff]  ;;  %v360_v42 = vld [vmem:[%s4278_s3 + $0x40] sm:$0xff] }
  0x18   :  { %2687 = vmatprep.subr.bf16.mxu1 %v2686_v59  ;;  %v31_v33 = vld [vmem:[%s4277_s0 + $0x10] sm:$0xff]  ;;  %v377_v38 = vld [vmem:[%s4278_s3 + $0xc8] sm:$0xff]  ;;  %v3559_v41 = vpack.c.bf16 %v357_v32, %v354_v31  ;;  %v363_v43 = vld [vmem:[%s4278_s3 + $0x58] sm:$0xff] }
  0x19   :  { %2661 = vmatpush1.bf16.msra.mxu0 %v2660_v53  ;;  %v32_v44 = vld [vmem:[%s4277_s0 + $0x18] sm:$0xff]  ;;  %v3575_v46 = vpack.c.bf16 %v380_v39, %v377_v38  ;;  %v376_v47 = vld [vmem:[%s4278_s3 + $0xc0] sm:$0xff]  ;;  %v386_v50 = vld [vmem:[%s4278_s3 + $0x110] sm:$0xff]  ;;  %v3590_v51 = vpack.c.bf16 %v363_v43, %v360_v42 }
  0x1a   :  { %2663 = vmatprep.subr.bf16.mxu0 %v2662_v54  ;;  %v379_v48 = vld [vmem:[%s4278_s3 + $0xd8] sm:$0xff]  ;;  %v366_v52 = vld [vmem:[%s4278_s3 + $0x70] sm:$0xff]  ;;  %v369_v53 = vld [vmem:[%s4278_s3 + $0x88] sm:$0xff] }
  0x1b   :  { %2689 = vmatpush3.bf16.msra.mxu1 %v2686_v59  ;;  %v383_v49 = vld [vmem:[%s4278_s3 + $0xf8] sm:$0xff]  ;;  %v33_v54 = vld [vmem:[%s4277_s0 + $0x20] sm:$0xff]  ;;  %v3604_v55 = vpack.c.bf16 %v379_v48, %v376_v47  ;;  %v382_v57 = vld [vmem:[%s4278_s3 + $0xf0] sm:$0xff]  ;;  %v3622_v61 = vpack.c.bf16 %v369_v53, %v366_v52 }
  0x1c   :  { %2691 = vmatprep.subr.bf16.mxu1 %v2690_v5  ;;  %v3607_v56 = vpack.c.bf16 %v386_v50, %v383_v49  ;;  %v385_v58 = vld [vmem:[%s4278_s3 + $0x108] sm:$0xff]  ;;  %v392_v60 = vld [vmem:[%s4278_s3 + $0x140] sm:$0xff]  ;;  %v35_v2 = vld [vmem:[%s4277_s0 + $0x30] sm:$0xff] }
  0x1d   :  { %2665 = vmatpush1.bf16.msra.mxu0 %v2664_v62  ;;  %v389_v59 = vld [vmem:[%s4278_s3 + $0x128] sm:$0xff]  ;;  %v372_v62 = vld [vmem:[%s4278_s3 + $0xa0] sm:$0xff]  ;;  %v3636_v1 = vpack.c.bf16 %v385_v58, %v382_v57  ;;  %v391_v6 = vld [vmem:[%s4278_s3 + $0x138] sm:$0xff] }
  0x1e   :  { %2667 = vmatprep.subr.bf16.mxu0 %v2666_v63  ;;  %v375_v63 = vld [vmem:[%s4278_s3 + $0xb8] sm:$0xff]  ;;  %v34_v0 = vld [vmem:[%s4277_s0 + $0x28] sm:$0xff]  ;;  %v3642_v4 = vpack.c.bf16 %v392_v60, %v389_v59  ;;  %v378_v11 = vld [vmem:[%s4278_s3 + $0xd0] sm:$0xff] }
  0x1f   :  { %2693 = vmatpush3.bf16.msra.mxu1 %v2690_v5  ;;  %v388_v5 = vld [vmem:[%s4278_s3 + $0x120] sm:$0xff]  ;;  %v395_v7 = vld [vmem:[%s4278_s3 + $0x158] sm:$0xff]  ;;  %v3657_v10 = vpack.c.bf16 %v375_v63, %v372_v62  ;;  %v381_v12 = vld [vmem:[%s4278_s3 + $0xe8] sm:$0xff] }
  0x20   :  { %2695 = vmatprep.subr.bf16.mxu1 %v2694_v14  ;;  %v3668_v13 = vpack.c.bf16 %v391_v6, %v388_v5  ;;  %v394_v16 = vld [vmem:[%s4278_s3 + $0x150] sm:$0xff]  ;;  %v397_v19 = vld [vmem:[%s4278_s3 + $0x168] sm:$0xff]  ;;  %v3683_v20 = vpack.c.bf16 %v381_v12, %v378_v11  ;;  %v384_v21 = vld [vmem:[%s4278_s3 + $0x100] sm:$0xff] }
  0x21   :  { %2669 = vmatpush1.bf16.msra.mxu0 %v2668_v8  ;;  %v398_v8 = vld [vmem:[%s4278_s3 + $0x170] sm:$0xff]  ;;  %v387_v22 = vld [vmem:[%s4278_s3 + $0x118] sm:$0xff]  ;;  %v393_v28 = vld [vmem:[%s4278_s3 + $0x148] sm:$0xff] }
  0x22   :  { %2703 = vmatprep.subr.bf16.mxu0 %v3470_v9  ;;  %v3674_v15 = vpack.c.bf16 %v398_v8, %v395_v7  ;;  %v390_v27 = vld [vmem:[%s4278_s3 + $0x130] sm:$0xff]  ;;  %v3714_v29 = vld [vmem:[%s4279_s1] sm:$0xff]  ;;  %v399_v32 = vld [vmem:[%s4278_s3 + $0x178] sm:$0xff] }
  0x23   :  { %2697 = vmatpush3.bf16.msra.mxu1 %v2694_v14  ;;  %v36_v14 = vld [vmem:[%s4277_s0 + $0x38] sm:$0xff]  ;;  %v3718_v30 = vpack.c.bf16 %v393_v28, %v390_v27  ;;  %v396_v31 = vld [vmem:[%s4278_s3 + $0x160] sm:$0xff] }
  0x24   :  { %167 = vmatmul.mubr.f32.vlgmr.msra.gmra.mrb[0].mxu0 %v3395_v36  ;;  %2699 = vmatprep.subr.bf16.mxu1 %v2698_v23  ;;  %v370_v36 = vld [vmem:[%s4278_s3 + $0x90] sm:$0xff]  ;;  %v85_v39 = vld [vmem:[%s4280_s4] sm:$0x7] }
  0x25   :  { %2705 = vmatpush1.bf16.msra.mxu0 %v3490_v17  ;;  %172 = vmatprep.mubr.f32.mxu0 %v3281_v3  ;;  %v3572_v45 = vpack.c.bf16 %v373_v37, %v370_v36  ;;  %v87_v36 = vlaneseq  ;;  %v344_v60 = vld [vmem:[%s4281_s5] sm:$0x7] }
  0x26   :  { %2707 = vmatprep.subr.bf16.mxu0 %v3493_v18 }
  0x27   :  { %2701 = vmatpush3.bf16.msra.mxu1 %v2698_v23  ;;  %v3696_v23 = vpack.c.bf16 %v397_v19, %v394_v16  ;;  %v88_v37 = vshrl.u32 %v87_v36, 7 }
  0x28   :  { %173 = vmatmul.mubr.f32.gmra.mrb[2].mxu0 %v30_v24  ;;  %2734 = vmatprep.subr.bf16.mxu1 %v3282_v40 }
  0x29   :  { %2709 = vmatpush1.bf16.msra.mxu0 %v3513_v25  ;;  %178 = vmatprep.mubr.f32.mxu0 %v3281_v3  ;;  %v97_v38 = vsub.s32 2, %v88_v37  ;;  %v89_v59 = vsub.s32 0, %v88_v37 }
  0x2a   :  { %2711 = vmatprep.subr.bf16.mxu0 %v3516_v26  ;;  %2347 = vmatmul.mubr.f32.vlgmr.msra.gmra.mrb[0].mxu1 %v30_v24  ;;  %v3700_v24 = vpack.c.bf16 %v387_v22, %v384_v21 }
  0x2b   :  { %2736 = vmatpush3.bf16.msra.mxu1 %v3559_v41  ;;  %2349 = vmatprep.mubr.f32.mxu1 %v31_v33  ;;  %v98_v42 = vrot.slane %v85_v39, %v97_v38  ;;  %v90_v6 = vrot.slane %v85_v39, %v89_v59  ;;  %v404_v7 = vrot.slane %v344_v60, %v89_v59 }
  0x2c   :  { %179 = vmatmul.mubr.f32.gmra.mrb[4].mxu0 %v31_v33  ;;  %2737 = vmatprep.subr.bf16.mxu1 %v3282_v40  ;;  %v3732_v33 = vpack.c.bf16 %v399_v32, %v396_v31 }
  0x2d   :  { %2713 = vmatpush1.bf16.msra.mxu0 %v3541_v34  ;;  %184 = vmatprep.mubr.f32.mxu0 %v3281_v3  ;;  %v3790_v12 = vadd.f32 %v404_v7, %v90_v6 }
  0x2e   :  { %2715 = vmatprep.subr.bf16.mxu0 %v3544_v35  ;;  %2350 = vmatmul.mubr.f32.gmra.mrb[2].mxu1 %v32_v44 }
  0x2f   :  { %2739 = vmatpush3.bf16.msra.mxu1 %v3590_v51  ;;  %2352 = vmatprep.mubr.f32.mxu1 %v33_v54 }
  0x30   :  { %185 = vmatmul.mubr.f32.gmra.mrb[6].mxu0 %v32_v44  ;;  %2740 = vmatprep.subr.bf16.mxu1 %v3282_v40 }
  0x31   :  { %2717 = vmatpush1.bf16.msra.mxu0 %v3572_v45  ;;  %190 = vmatprep.mubr.f32.mxu0 %v3281_v3 }
  0x32   :  { %2719 = vmatprep.subr.bf16.mxu0 %v3575_v46  ;;  %2353 = vmatmul.mubr.f32.gmra.mrb[4].mxu1 %v34_v0 }
  0x33   :  { %2742 = vmatpush3.bf16.msra.mxu1 %v3622_v61  ;;  %2355 = vmatprep.mubr.f32.mxu1 %v35_v2 }
  0x34   :  { %191 = vmatmul.mubr.f32.gmra.mrb[8].mxu0 %v33_v54  ;;  %2743 = vmatprep.subr.bf16.mxu1 %v3282_v40 }
  0x35   :  { %2721 = vmatpush1.bf16.msra.mxu0 %v3604_v55  ;;  %196 = vmatprep.mubr.f32.mxu0 %v3281_v3 }
  0x36   :  { %2723 = vmatprep.subr.bf16.mxu0 %v3607_v56  ;;  %2356 = vmatmul.mubr.f32.gmra.mrb[6].mxu1 %v36_v14 }
  0x37   :  { %2745 = vmatpush3.bf16.msra.mxu1 %v3657_v10  ;;  %2390 = vmatprep.mubr.msk.f32.mxu1 %vm3283_vm0, %v3281_v3 }
  0x38   :  { %197 = vmatmul.mubr.f32.gmra.mrb[10].mxu0 %v34_v0  ;;  %2746 = vmatprep.subr.bf16.mxu1 %v3282_v40 }
  0x39   :  { %2725 = vmatpush1.bf16.msra.mxu0 %v3636_v1  ;;  %202 = vmatprep.mubr.f32.mxu0 %v3281_v3 }
  0x3a   :  { %2727 = vmatprep.subr.bf16.mxu0 %v3642_v4 }
  0x3b   :  { %2748 = vmatpush3.bf16.msra.mxu1 %v3683_v20 }
  0x3c   :  { %203 = vmatmul.mubr.f32.gmra.mrb[12].mxu0 %v35_v2  ;;  %2749 = vmatprep.subr.bf16.mxu1 %v3282_v40  ;;  %v93_v2 = vsub.s32 1, %v88_v37 }
  0x3d   :  { %2729 = vmatpush1.bf16.msra.mxu0 %v3668_v13  ;;  %208 = vmatprep.mubr.f32.mxu0 %v3281_v3 }
  0x3e   :  { %2731 = vmatprep.subr.bf16.mxu0 %v3674_v15  ;;  %v94_v8 = vrot.slane %v85_v39, %v93_v2  ;;  %v408_v11 = vrot.slane %v344_v60, %v93_v2  ;;  %v3796_v39 = vrot.slane %v344_v60, %v97_v38 }
  0x3f   :  { %2751 = vmatpush3.bf16.msra.mxu1 %v3700_v24 }
  0x40   :  { %209 = vmatmul.mubr.f32.gmra.mrb[14].mxu0 %v36_v14  ;;  %2752 = vmatprep.subr.bf16.mxu1 %v3282_v40  ;;  %v3792_v16 = vadd.f32 %v408_v11, %v94_v8 }
  0x41   :  { %2733 = vmatpush1.bf16.msra.mxu0 %v3696_v23  ;;  %480 = vmatprep.mubr.f32.mxu0 %v3281_v3 }
  0x42   :  { %2759 = vmatprep.subr.bf16.mxu0 %v3470_v9 }
  0x43   :  { %2754 = vmatpush3.bf16.msra.mxu1 %v3718_v30 }
  0x44   :  { %481 = vmatmul.mubr.f32.vlgmr.msra.gmra.mrb[0].mxu0 %v3714_v29  ;;  %2755 = vmatprep.subr.bf16.mxu1 %v3282_v40 }
  0x45   :  { %2761 = vmatpush1.bf16.msra.mxu0 %v3490_v17  ;;  %699 = vmatprep.mubr.f32.mxu0 %v3281_v3 }
  0x46   :  { %2763 = vmatprep.subr.bf16.mxu0 %v3493_v18 }
  0x47   :  { %2757 = vmatpush3.bf16.msra.mxu1 %v3732_v33 }
  0x48   :  { %2790 = vmatprep.subr.bf16.mxu1 %v3282_v40 }
  0x49   :  { %2765 = vmatpush1.bf16.msra.mxu0 %v3513_v25 }
  0x4a   :  { %2767 = vmatprep.subr.bf16.mxu0 %v3516_v26  ;;  %2391 = vmatmul.mubr.f32.vlgmr.msra.gmra.mrb[8].mxu1 %v3714_v29 }
  0x4b   :  { %2792 = vmatpush3.bf16.msra.mxu1 %v3559_v41  ;;  %2425 = vmatprep.mubr.msk.f32.mxu1 %vm3283_vm0, %v3281_v3 }
  0x4c   :  { %2793 = vmatprep.subr.bf16.mxu1 %v3282_v40 }
  0x4d   :  { %2769 = vmatpush1.bf16.msra.mxu0 %v3541_v34 }
  0x4e   :  { %2771 = vmatprep.subr.bf16.mxu0 %v3544_v35 }
  0x4f   :  { %2795 = vmatpush3.bf16.msra.mxu1 %v3590_v51 }
  0x50   :  { %2796 = vmatprep.subr.bf16.mxu1 %v3282_v40 }
  0x51   :  { %2773 = vmatpush1.bf16.msra.mxu0 %v3572_v45 }
  0x52   :  { %2775 = vmatprep.subr.bf16.mxu0 %v3575_v46 }
  0x53   :  { %2798 = vmatpush3.bf16.msra.mxu1 %v3622_v61 }
  0x54   :  { %2799 = vmatprep.subr.bf16.mxu1 %v3282_v40 }
  0x55   :  { %2777 = vmatpush1.bf16.msra.mxu0 %v3604_v55 }
  0x56   :  { %2779 = vmatprep.subr.bf16.mxu0 %v3607_v56 }
  0x57   :  { %2801 = vmatpush3.bf16.msra.mxu1 %v3657_v10 }
  0x58   :  { %2802 = vmatprep.subr.bf16.mxu1 %v3282_v40 }
  0x59   :  { %2781 = vmatpush1.bf16.msra.mxu0 %v3636_v1 }
  0x5a   :  { %2783 = vmatprep.subr.bf16.mxu0 %v3642_v4 }
  0x5b   :  { %2804 = vmatpush3.bf16.msra.mxu1 %v3683_v20 }
  0x5c   :  { %2805 = vmatprep.subr.bf16.mxu1 %v3282_v40 }
  0x5d   :  { %2785 = vmatpush1.bf16.msra.mxu0 %v3668_v13 }
  0x5e   :  { %2787 = vmatprep.subr.bf16.mxu0 %v3674_v15 }
  0x5f   :  { %2807 = vmatpush3.bf16.msra.mxu1 %v3700_v24 }
  0x60   :  { %2808 = vmatprep.subr.bf16.mxu1 %v3282_v40 }
  0x61   :  { %2789 = vmatpush1.bf16.msra.mxu0 %v3696_v23 }
  0x62   :  { %2815 = vmatprep.subr.bf16.mxu0 %v3470_v9 }
  0x63   :  { %2810 = vmatpush3.bf16.msra.mxu1 %v3718_v30 }
  0x64   :  { %2811 = vmatprep.subr.bf16.mxu1 %v3282_v40 }
  0x67   :  { %2813 = vmatpush3.bf16.msra.mxu1 %v3732_v33 }
  0x68   :  { %2846 = vmatprep.subr.bf16.mxu1 %v3282_v40 }
  0xfd   :  { %v2348_v43 = vpop.f32.mrb[0].mxu1 }
  0xfe   :  { %v3773_v44 = vadd.f32 %v2348_v43, %v98_v42  ;;  %v281_v47 = vpop.f32.mrb[1].mxu1 }
 0x101   :  { %v2351_v48 = vpop.f32.mrb[2].mxu1 }
 0x102   :  { %v3775_v49 = vadd.f32 %v2351_v48, %v98_v42  ;;  %v291_v50 = vpop.f32.mrb[3].mxu1 }
 0x103   :  { %v3777_v52 = vadd.f32 %v291_v50, %v98_v42 }
 0x105   :  { %v2354_v53 = vpop.f32.mrb[4].mxu1 }
 0x106   :  { %v3779_v54 = vadd.f32 %v2354_v53, %v98_v42  ;;  %v301_v57 = vpop.f32.mrb[5].mxu1 }
 0x107   :  { %v3781_v58 = vadd.f32 %v301_v57, %v98_v42  ;;  %v282_v57 = vadd.f32 %v281_v47, %v98_v42 }
 0x109   :  { %v2357_v62 = vpop.f32.mrb[6].mxu1 }
 0x10a   :  { %v3786_v63 = vadd.f32 %v2357_v62, %v98_v42  ;;  %v311_v0 = vpop.f32.mrb[7].mxu1 }
 0x10b   :  { %v3788_v5 = vadd.f32 %v311_v0, %v98_v42 }
 0x117   :  { %v482_v14 = vpop.f32.mrb[0].mxu0 }
 0x118   :  { %v3151_v19 = vadd.f32 %v3790_v12, %v482_v14  ;;  %v484_v21 = vpop.f32.mrb[1].mxu0 }
 0x119   :  { %v3153_v27 = vadd.f32 %v3792_v16, %v484_v21 }
 0x11a   :  { %v2131_v22 = vmul.f32 -1.442695, %v3151_v19 }
 0x11b   :  { %v2132_v28 = vmul.f32 -1.442695, %v3153_v27 }
 0x11c   :  { %3201 = vpow2.f32 %v2131_v22 }
 0x11d   :  { %v553_v31 = vpop.f32.mrb[8].mxu1  ;;  %3203 = vpow2.f32 %v2132_v28 }
 0x11e   :  { %v2392_v32 = vpop.f32.mrb[9].mxu1  ;;  %v554_v50 = vadd.f32 %v553_v31, %v3796_v39 }
 0x126   :  { %v3202_v36 = vpop.eup %3201 }
 0x127   :  { %v561_v37 = vadd.f32 1.0, %v3202_v36  ;;  %v3204_v43 = vpop.eup %3203 }
 0x128   :  { %v568_v48 = vadd.f32 1.0, %v3204_v43 }
 0x129   :  { %3205 = vrcp.f32 %v561_v37 }
 0x12a   :  { %3207 = vrcp.f32 %v568_v48 }
 0x133   :  { %v3206_v53 = vpop.eup %3205 }
 0x134   :  { %v571_v59 = vmul.f32 %v3206_v53, %v554_v50  ;;  %v3208_v0 = vpop.eup %3207 }
 0x135   :  { %v574_v2 = vsub.f32 1.0, %v3208_v0  ;;  %v576_v8 = vmul.f32 %v3208_v0, %v3714_v29  ;;  %v1250_v0 = vld [vmem:[%s4278_s3 + $0x18] sm:$0xff] }
 0x136   :  { %v572_v62 = vadd.f32 %v571_v59, %v282_v57 }
 0x138   :  { %3209 = vtanh.f32 %v572_v62  ;;  %v1247_v62 = vld [vmem:[%s4278_s3] sm:$0xff] }
 0x142   :  { %v3210_v6 = vpop.eup %3209 }
 0x143   :  { %v575_v7 = vmul.f32 %v3210_v6, %v574_v2  ;;  %v1249_v2 = vld [vmem:[%s4278_s3 + $0x10] sm:$0xff]  ;;  %v3917_v6 = vpack.c.bf16 %v1250_v0, %v1247_v62  ;;  %v1287_v62 = vld [vmem:[%s4278_s3 + $0x140] sm:$0xff] }
 0x144   :  { %v1283_v0 = vld [vmem:[%s4278_s3 + $0x120] sm:$0xff] }
 0x145   :  { %v3800_v11 = vadd.f32 %v576_v8, %v575_v7  ;;  %v1252_v7 = vld [vmem:[%s4278_s3 + $0x28] sm:$0xff] }
 0x146   :  { %v3923_v8 = vpack.c.bf16 %v1252_v7, %v1249_v2  ;;  %v1286_v7 = vld [vmem:[%s4278_s3 + $0x138] sm:$0xff] }
 0x147   :  { %579 = vst [vmem:[%s4282_s6] sm:$0xff] %v3800_v11  ;;  %700 = vmatmul.mubr.f32.vlgmr.msra.gmra.mrb[2].mxu0 %v3800_v11  ;;  %2426 = vmatmul.mubr.f32.vlgmr.msra.gmra.mrb[10].mxu1 %v3800_v11 }
 0x148   :  { %2817 = vmatpush1.bf16.msra.mxu0 %v3490_v17  ;;  %2848 = vmatpush3.bf16.msra.mxu1 %v3559_v41 }
 0x149   :  { %2819 = vmatprep.subr.bf16.mxu0 %v3493_v18  ;;  %2849 = vmatprep.subr.bf16.mxu1 %v3282_v40 }
 0x14a   :  { %919 = vmatprep.mubr.f32.mxu0 %v3281_v3  ;;  %2460 = vmatprep.mubr.msk.f32.mxu1 %vm3283_vm0, %v3281_v3 }
 0x14c   :  { %2821 = vmatpush1.bf16.msra.mxu0 %v3513_v25  ;;  %2851 = vmatpush3.bf16.msra.mxu1 %v3590_v51 }
 0x14d   :  { %2823 = vmatprep.subr.bf16.mxu0 %v3516_v26  ;;  %2852 = vmatprep.subr.bf16.mxu1 %v3282_v40 }
 0x150   :  { %2825 = vmatpush1.bf16.msra.mxu0 %v3541_v34  ;;  %2854 = vmatpush3.bf16.msra.mxu1 %v3622_v61 }
 0x151   :  { %2827 = vmatprep.subr.bf16.mxu0 %v3544_v35  ;;  %2855 = vmatprep.subr.bf16.mxu1 %v3282_v40 }
 0x154   :  { %2829 = vmatpush1.bf16.msra.mxu0 %v3572_v45  ;;  %2857 = vmatpush3.bf16.msra.mxu1 %v3657_v10 }
 0x155   :  { %2831 = vmatprep.subr.bf16.mxu0 %v3575_v46  ;;  %2858 = vmatprep.subr.bf16.mxu1 %v3282_v40 }
 0x158   :  { %2833 = vmatpush1.bf16.msra.mxu0 %v3604_v55  ;;  %2860 = vmatpush3.bf16.msra.mxu1 %v3683_v20 }
 0x159   :  { %2835 = vmatprep.subr.bf16.mxu0 %v3607_v56  ;;  %2861 = vmatprep.subr.bf16.mxu1 %v3282_v40 }
 0x15c   :  { %2837 = vmatpush1.bf16.msra.mxu0 %v3636_v1  ;;  %2863 = vmatpush3.bf16.msra.mxu1 %v3700_v24 }
 0x15d   :  { %2839 = vmatprep.subr.bf16.mxu0 %v3642_v4  ;;  %2864 = vmatprep.subr.bf16.mxu1 %v3282_v40 }
 0x160   :  { %2841 = vmatpush1.bf16.msra.mxu0 %v3668_v13  ;;  %2866 = vmatpush3.bf16.msra.mxu1 %v3718_v30 }
 0x161   :  { %2843 = vmatprep.subr.bf16.mxu0 %v3674_v15  ;;  %2867 = vmatprep.subr.bf16.mxu1 %v3282_v40 }
 0x164   :  { %2845 = vmatpush1.bf16.msra.mxu0 %v3696_v23  ;;  %2869 = vmatpush3.bf16.msra.mxu1 %v3732_v33 }
 0x165   :  { %2871 = vmatprep.subr.bf16.mxu0 %v3470_v9  ;;  %2902 = vmatprep.subr.bf16.mxu1 %v3282_v40 }
 0x21a   :  { %v701_v29 = vpop.f32.mrb[2].mxu0  ;;  %v772_v38 = vpop.f32.mrb[10].mxu1 }
 0x21b   :  { %v3155_v42 = vadd.f32 %v3790_v12, %v701_v29  ;;  %v703_v47 = vpop.f32.mrb[3].mxu0  ;;  %v2427_v60 = vpop.f32.mrb[11].mxu1  ;;  %v773_v9 = vadd.f32 %v772_v38, %v3796_v39  ;;  %v1257_v29 = vld [vmem:[%s4278_s3 + $0x50] sm:$0xff] }
 0x21c   :  { %v3157_v19 = vadd.f32 %v3792_v16, %v703_v47  ;;  %v1256_v47 = vld [vmem:[%s4278_s3 + $0x48] sm:$0xff]  ;;  %v1255_v60 = vld [vmem:[%s4278_s3 + $0x40] sm:$0xff] }
 0x21d   :  { %v2133_v14 = vmul.f32 -1.442695, %v3155_v42  ;;  %v1253_v42 = vld [vmem:[%s4278_s3 + $0x30] sm:$0xff] }
 0x21e   :  { %v2134_v21 = vmul.f32 -1.442695, %v3157_v19  ;;  %v1258_v19 = vld [vmem:[%s4278_s3 + $0x58] sm:$0xff] }
 0x21f   :  { %3211 = vpow2.f32 %v2133_v14  ;;  %v3945_v14 = vpack.c.bf16 %v1256_v47, %v1253_v42  ;;  %v4086_v42 = vpack.c.bf16 %v1286_v7, %v1283_v0  ;;  %v1290_v47 = vld [vmem:[%s4278_s3 + $0x158] sm:$0xff] }
 0x220   :  { %3213 = vpow2.f32 %v2134_v21  ;;  %v3951_v21 = vpack.c.bf16 %v1258_v19, %v1255_v60  ;;  %v1293_v60 = vld [vmem:[%s4278_s3 + $0x170] sm:$0xff] }
 0x229   :  { %v3212_v22 = vpop.eup %3211 }
 0x22a   :  { %v780_v27 = vadd.f32 1.0, %v3212_v22  ;;  %v3214_v28 = vpop.eup %3213  ;;  %v1260_v22 = vld [vmem:[%s4278_s3 + $0x68] sm:$0xff] }
 0x22b   :  { %v787_v31 = vadd.f32 1.0, %v3214_v28 }
 0x22c   :  { %3215 = vrcp.f32 %v780_v27  ;;  %v1263_v27 = vld [vmem:[%s4278_s3 + $0x80] sm:$0xff] }
 0x22d   :  { %3217 = vrcp.f32 %v787_v31  ;;  %v3961_v28 = vpack.c.bf16 %v1263_v27, %v1260_v22  ;;  %v1259_v31 = vld [vmem:[%s4278_s3 + $0x60] sm:$0xff]  ;;  %v4098_v22 = vpack.c.bf16 %v1293_v60, %v1290_v47  ;;  %v1289_v27 = vld [vmem:[%s4278_s3 + $0x150] sm:$0xff] }
 0x236   :  { %v3216_v32 = vpop.eup %3215 }
 0x237   :  { %v790_v36 = vmul.f32 %v3216_v32, %v773_v9  ;;  %v3218_v43 = vpop.eup %3217  ;;  %v1262_v9 = vld [vmem:[%s4278_s3 + $0x78] sm:$0xff]  ;;  %v1261_v32 = vld [vmem:[%s4278_s3 + $0x70] sm:$0xff] }
 0x238   :  { %v793_v48 = vsub.f32 1.0, %v3218_v43  ;;  %v795_v57 = vmul.f32 %v3218_v43, %v3800_v11  ;;  %v1254_v11 = vld [vmem:[%s4278_s3 + $0x38] sm:$0xff] }
 0x239   :  { %v791_v37 = vadd.f32 %v790_v36, %v3773_v44  ;;  %v1251_v44 = vld [vmem:[%s4278_s3 + $0x20] sm:$0xff]  ;;  %v3933_v38 = vpack.c.bf16 %v1257_v29, %v1254_v11  ;;  %v3973_v36 = vpack.c.bf16 %v1262_v9, %v1259_v31  ;;  %v1285_v11 = vld [vmem:[%s4278_s3 + $0x130] sm:$0xff]  ;;  %v1288_v29 = vld [vmem:[%s4278_s3 + $0x148] sm:$0xff] }
 0x23a   :  { %v4096_v19 = vpack.c.bf16 %v1288_v29, %v1285_v11  ;;  %v1292_v31 = vld [vmem:[%s4278_s3 + $0x168] sm:$0xff]  ;;  %v1291_v9 = vld [vmem:[%s4278_s3 + $0x160] sm:$0xff] }
 0x23b   :  { %3219 = vtanh.f32 %v791_v37  ;;  %v1264_v37 = vld [vmem:[%s4278_s3 + $0x88] sm:$0xff] }
 0x23c   :  { %v3979_v43 = vpack.c.bf16 %v1264_v37, %v1261_v32  ;;  %v1294_v32 = vld [vmem:[%s4278_s3 + $0x178] sm:$0xff]  ;;  %v4114_v37 = vpack.c.bf16 %v1292_v31, %v1289_v27 }
 0x245   :  { %v3220_v50 = vpop.eup %3219 }
 0x246   :  { %v794_v53 = vmul.f32 %v3220_v50, %v793_v48  ;;  %v1266_v48 = vld [vmem:[%s4278_s3 + $0x98] sm:$0xff]  ;;  %v1269_v50 = vld [vmem:[%s4278_s3 + $0xb0] sm:$0xff] }
 0x248   :  { %v796_v59 = vadd.f32 %v795_v57, %v794_v53  ;;  %v3989_v53 = vpack.c.bf16 %v1269_v50, %v1266_v48  ;;  %v1265_v57 = vld [vmem:[%s4278_s3 + $0x90] sm:$0xff]  ;;  %v4118_v48 = vpack.c.bf16 %v1294_v32, %v1291_v9 }
 0x24a   :  { %2135 = vst [vmem:[%s4282_s6 + $0x8] sm:$0xff] %v796_v59  ;;  %920 = vmatmul.mubr.f32.vlgmr.msra.gmra.mrb[4].mxu0 %v796_v59  ;;  %2461 = vmatmul.mubr.f32.vlgmr.msra.gmra.mrb[12].mxu1 %v796_v59 }
 0x24b   :  { %2873 = vmatpush1.bf16.msra.mxu0 %v3490_v17  ;;  %2904 = vmatpush3.bf16.msra.mxu1 %v3559_v41 }
 0x24c   :  { %2875 = vmatprep.subr.bf16.mxu0 %v3493_v18  ;;  %2905 = vmatprep.subr.bf16.mxu1 %v3282_v40 }
 0x24d   :  { %1139 = vmatprep.mubr.f32.mxu0 %v3281_v3  ;;  %2495 = vmatprep.mubr.msk.f32.mxu1 %vm3283_vm0, %v3281_v3 }
 0x24f   :  { %2877 = vmatpush1.bf16.msra.mxu0 %v3513_v25  ;;  %2907 = vmatpush3.bf16.msra.mxu1 %v3590_v51 }
 0x250   :  { %2879 = vmatprep.subr.bf16.mxu0 %v3516_v26  ;;  %2908 = vmatprep.subr.bf16.mxu1 %v3282_v40 }
 0x253   :  { %2881 = vmatpush1.bf16.msra.mxu0 %v3541_v34  ;;  %2910 = vmatpush3.bf16.msra.mxu1 %v3622_v61 }
 0x254   :  { %2883 = vmatprep.subr.bf16.mxu0 %v3544_v35  ;;  %2911 = vmatprep.subr.bf16.mxu1 %v3282_v40 }
 0x257   :  { %2885 = vmatpush1.bf16.msra.mxu0 %v3572_v45  ;;  %2913 = vmatpush3.bf16.msra.mxu1 %v3657_v10 }
 0x258   :  { %2887 = vmatprep.subr.bf16.mxu0 %v3575_v46  ;;  %2914 = vmatprep.subr.bf16.mxu1 %v3282_v40 }
 0x25b   :  { %2889 = vmatpush1.bf16.msra.mxu0 %v3604_v55  ;;  %2916 = vmatpush3.bf16.msra.mxu1 %v3683_v20 }
 0x25c   :  { %2891 = vmatprep.subr.bf16.mxu0 %v3607_v56  ;;  %2917 = vmatprep.subr.bf16.mxu1 %v3282_v40 }
 0x25f   :  { %2893 = vmatpush1.bf16.msra.mxu0 %v3636_v1  ;;  %2919 = vmatpush3.bf16.msra.mxu1 %v3700_v24 }
 0x260   :  { %2895 = vmatprep.subr.bf16.mxu0 %v3642_v4  ;;  %2920 = vmatprep.subr.bf16.mxu1 %v3282_v40 }
 0x263   :  { %2897 = vmatpush1.bf16.msra.mxu0 %v3668_v13  ;;  %2922 = vmatpush3.bf16.msra.mxu1 %v3718_v30 }
 0x264   :  { %2899 = vmatprep.subr.bf16.mxu0 %v3674_v15  ;;  %2923 = vmatprep.subr.bf16.mxu1 %v3282_v40 }
 0x267   :  { %2901 = vmatpush1.bf16.msra.mxu0 %v3696_v23  ;;  %2925 = vmatpush3.bf16.msra.mxu1 %v3732_v33  ;;  %v1248_v33 = vld [vmem:[%s4278_s3 + $0x8] sm:$0xff] }
 0x268   :  { %2958 = vmatprep.subr.bf16.mxu1 %v3282_v40 }
 0x31d   :  { %v921_v17 = vpop.f32.mrb[4].mxu0  ;;  %v992_v18 = vpop.f32.mrb[12].mxu1 }
 0x31e   :  { %v3159_v25 = vadd.f32 %v3790_v12, %v921_v17  ;;  %v923_v26 = vpop.f32.mrb[5].mxu0  ;;  %v2462_v34 = vpop.f32.mrb[13].mxu1  ;;  %v993_v61 = vadd.f32 %v992_v18, %v3796_v39  ;;  %v1267_v17 = vld [vmem:[%s4278_s3 + $0xa0] sm:$0xff] }
 0x31f   :  { %v3161_v41 = vadd.f32 %v3792_v16, %v923_v26  ;;  %v1272_v34 = vld [vmem:[%s4278_s3 + $0xc8] sm:$0xff] }
 0x320   :  { %v2136_v35 = vmul.f32 -1.442695, %v3159_v25  ;;  %v1270_v25 = vld [vmem:[%s4278_s3 + $0xb8] sm:$0xff] }
 0x321   :  { %v2137_v45 = vmul.f32 -1.442695, %v3161_v41  ;;  %v4007_v26 = vpack.c.bf16 %v1270_v25, %v1267_v17 }
 0x322   :  { %3221 = vpow2.f32 %v2136_v35  ;;  %v1275_v35 = vld [vmem:[%s4278_s3 + $0xe0] sm:$0xff] }
 0x323   :  { %3223 = vpow2.f32 %v2137_v45  ;;  %v4017_v41 = vpack.c.bf16 %v1275_v35, %v1272_v34  ;;  %v1271_v45 = vld [vmem:[%s4278_s3 + $0xc0] sm:$0xff] }
 0x32c   :  { %v3222_v46 = vpop.eup %3221 }
 0x32d   :  { %v1000_v51 = vadd.f32 1.0, %v3222_v46  ;;  %v3224_v55 = vpop.eup %3223  ;;  %v1274_v46 = vld [vmem:[%s4278_s3 + $0xd8] sm:$0xff] }
 0x32e   :  { %v1007_v56 = vadd.f32 1.0, %v3224_v55  ;;  %v4029_v55 = vpack.c.bf16 %v1274_v46, %v1271_v45 }
 0x32f   :  { %3225 = vrcp.f32 %v1000_v51  ;;  %v1273_v51 = vld [vmem:[%s4278_s3 + $0xd0] sm:$0xff] }
 0x330   :  { %3227 = vrcp.f32 %v1007_v56  ;;  %v1276_v56 = vld [vmem:[%s4278_s3 + $0xe8] sm:$0xff] }
 0x339   :  { %v3226_v1 = vpop.eup %3225 }
 0x33a   :  { %v1010_v4 = vmul.f32 %v3226_v1, %v993_v61  ;;  %v3228_v13 = vpop.eup %3227  ;;  %v4035_v61 = vpack.c.bf16 %v1276_v56, %v1273_v51  ;;  %v1278_v1 = vld [vmem:[%s4278_s3 + $0xf8] sm:$0xff] }
 0x33b   :  { %v1013_v15 = vsub.f32 1.0, %v3228_v13  ;;  %v1015_v24 = vmul.f32 %v3228_v13, %v796_v59  ;;  %v1268_v59 = vld [vmem:[%s4278_s3 + $0xa8] sm:$0xff] }
 0x33c   :  { %v1011_v10 = vadd.f32 %v1010_v4, %v3777_v52  ;;  %v3906_v52 = vpack.c.bf16 %v1251_v44, %v1248_v33  ;;  %v4001_v18 = vpack.c.bf16 %v1268_v59, %v1265_v57  ;;  %v1281_v4 = vld [vmem:[%s4278_s3 + $0x110] sm:$0xff]  ;;  %v1284_v44 = vld [vmem:[%s4278_s3 + $0x128] sm:$0xff] }
 0x33d   :  { %v4048_v13 = vpack.c.bf16 %v1281_v4, %v1278_v1  ;;  %v4074_v2 = vpack.c.bf16 %v1287_v62, %v1284_v44 }
 0x33e   :  { %3229 = vtanh.f32 %v1011_v10  ;;  %2927 = vmatprep.subr.bf16.mxu0 %v3906_v52  ;;  %v1277_v10 = vld [vmem:[%s4278_s3 + $0xf0] sm:$0xff] }
 0x348   :  { %v3230_v20 = vpop.eup %3229 }
 0x349   :  { %v1014_v23 = vmul.f32 %v3230_v20, %v1013_v15  ;;  %v1280_v15 = vld [vmem:[%s4278_s3 + $0x108] sm:$0xff]  ;;  %v1279_v20 = vld [vmem:[%s4278_s3 + $0x100] sm:$0xff] }
 0x34b   :  { %v3889_v30 = vadd.f32 %v1015_v24, %v1014_v23  ;;  %v1282_v23 = vld [vmem:[%s4278_s3 + $0x118] sm:$0xff]  ;;  %v4060_v24 = vpack.c.bf16 %v1280_v15, %v1277_v10 }
 0x34c   :  { %v4062_v33 = vpack.c.bf16 %v1282_v23, %v1279_v20 }
 0x34d   :  { %2138 = vst [vmem:[%s4282_s6 + $0x10] sm:$0xff] %v3889_v30  ;;  %1140 = vmatmul.mubr.f32.vlgmr.msra.gmra.mrb[6].mxu0 %v3889_v30  ;;  %2496 = vmatmul.mubr.f32.vlgmr.msra.gmra.mrb[14].mxu1 %v3889_v30 }
 0x34e   :  { %1359 = vmatprep.mubr.f32.mxu0 %v3281_v3  ;;  %2530 = vmatprep.mubr.msk.f32.mxu1 %vm3283_vm0, %v3281_v3 }
 0x34f   :  { %2929 = vmatpush1.bf16.msra.mxu0 %v3917_v6  ;;  %2960 = vmatpush3.bf16.msra.mxu1 %v3923_v8 }
 0x350   :  { %2961 = vmatprep.subr.bf16.mxu1 %v3282_v40  ;;  %2931 = vmatprep.subr.bf16.mxu0 %v3933_v38 }
 0x353   :  { %2933 = vmatpush1.bf16.msra.mxu0 %v3945_v14  ;;  %2963 = vmatpush3.bf16.msra.mxu1 %v3951_v21 }
 0x354   :  { %2964 = vmatprep.subr.bf16.mxu1 %v3282_v40  ;;  %2935 = vmatprep.subr.bf16.mxu0 %v3961_v28 }
 0x357   :  { %2937 = vmatpush1.bf16.msra.mxu0 %v3973_v36  ;;  %2966 = vmatpush3.bf16.msra.mxu1 %v3979_v43 }
 0x358   :  { %2967 = vmatprep.subr.bf16.mxu1 %v3282_v40  ;;  %2939 = vmatprep.subr.bf16.mxu0 %v3989_v53 }
 0x35b   :  { %2941 = vmatpush1.bf16.msra.mxu0 %v4001_v18  ;;  %2969 = vmatpush3.bf16.msra.mxu1 %v4007_v26 }
 0x35c   :  { %2970 = vmatprep.subr.bf16.mxu1 %v3282_v40  ;;  %2943 = vmatprep.subr.bf16.mxu0 %v4017_v41 }
 0x35f   :  { %2945 = vmatpush1.bf16.msra.mxu0 %v4029_v55  ;;  %2972 = vmatpush3.bf16.msra.mxu1 %v4035_v61 }
 0x360   :  { %2973 = vmatprep.subr.bf16.mxu1 %v3282_v40  ;;  %2947 = vmatprep.subr.bf16.mxu0 %v4048_v13 }
 0x363   :  { %2949 = vmatpush1.bf16.msra.mxu0 %v4060_v24  ;;  %2975 = vmatpush3.bf16.msra.mxu1 %v4062_v33 }
 0x364   :  { %2951 = vmatprep.subr.bf16.mxu0 %v4074_v2  ;;  %2976 = vmatprep.subr.bf16.mxu1 %v3282_v40 }
 0x367   :  { %2953 = vmatpush1.bf16.msra.mxu0 %v4086_v42  ;;  %2978 = vmatpush3.bf16.msra.mxu1 %v4096_v19 }
 0x368   :  { %2955 = vmatprep.subr.bf16.mxu0 %v4098_v22  ;;  %2979 = vmatprep.subr.bf16.mxu1 %v3282_v40 }
 0x36b   :  { %2957 = vmatpush1.bf16.msra.mxu0 %v4114_v37  ;;  %2981 = vmatpush3.bf16.msra.mxu1 %v4118_v48 }
 0x36c   :  { %2983 = vmatprep.subr.bf16.mxu0 %v3906_v52  ;;  %3014 = vmatprep.subr.bf16.mxu1 %v3282_v40 }
 0x420   :  { %v1141_v50 = vpop.f32.mrb[6].mxu0  ;;  %v1212_v57 = vpop.f32.mrb[14].mxu1 }
 0x421   :  { %v3163_v59 = vadd.f32 %v3790_v12, %v1141_v50  ;;  %v1143_v17 = vpop.f32.mrb[7].mxu0  ;;  %v2497_v25 = vpop.f32.mrb[15].mxu1  ;;  %v1213_v4 = vadd.f32 %v1212_v57, %v3796_v39 }
 0x422   :  { %v3165_v35 = vadd.f32 %v3792_v16, %v1143_v17 }
 0x423   :  { %v2139_v34 = vmul.f32 -1.442695, %v3163_v59 }
 0x424   :  { %v2140_v45 = vmul.f32 -1.442695, %v3165_v35 }
 0x425   :  { %3231 = vpow2.f32 %v2139_v34 }
 0x426   :  { %3233 = vpow2.f32 %v2140_v45 }
 0x42f   :  { %v3232_v46 = vpop.eup %3231 }
 0x430   :  { %v1220_v51 = vadd.f32 1.0, %v3232_v46  ;;  %v3234_v56 = vpop.eup %3233 }
 0x431   :  { %v1227_v1 = vadd.f32 1.0, %v3234_v56 }
 0x432   :  { %3235 = vrcp.f32 %v1220_v51 }
 0x433   :  { %3237 = vrcp.f32 %v1227_v1 }
 0x43c   :  { %v3236_v10 = vpop.eup %3235 }
 0x43d   :  { %v1230_v15 = vmul.f32 %v3236_v10, %v1213_v4  ;;  %v3238_v23 = vpop.eup %3237 }
 0x43e   :  { %v1233_v44 = vsub.f32 1.0, %v3238_v23  ;;  %v1235_v7 = vmul.f32 %v3238_v23, %v3889_v30 }
 0x43f   :  { %v1231_v20 = vadd.f32 %v1230_v15, %v3775_v49 }
 0x441   :  { %3239 = vtanh.f32 %v1231_v20 }
 0x44b   :  { %v3240_v62 = vpop.eup %3239 }
 0x44c   :  { %v1234_v0 = vmul.f32 %v3240_v62, %v1233_v44 }
 0x44e   :  { %v4130_v11 = vadd.f32 %v1235_v7, %v1234_v0 }
 0x450   :  { %2141 = vst [vmem:[%s4282_s6 + $0x18] sm:$0xff] %v4130_v11  ;;  %1360 = vmatmul.mubr.f32.vlgmr.msra.gmra.mrb[8].mxu0 %v4130_v11  ;;  %2531 = vmatmul.mubr.f32.vlgmr.msra.gmra.mrb[16].mxu1 %v4130_v11 }
 0x451   :  { %2985 = vmatpush1.bf16.msra.mxu0 %v3917_v6  ;;  %3016 = vmatpush3.bf16.msra.mxu1 %v3923_v8 }
 0x452   :  { %2987 = vmatprep.subr.bf16.mxu0 %v3933_v38  ;;  %3017 = vmatprep.subr.bf16.mxu1 %v3282_v40 }
 0x453   :  { %1579 = vmatprep.mubr.f32.mxu0 %v3281_v3  ;;  %2565 = vmatprep.mubr.msk.f32.mxu1 %vm3283_vm0, %v3281_v3 }
 0x455   :  { %2989 = vmatpush1.bf16.msra.mxu0 %v3945_v14  ;;  %3019 = vmatpush3.bf16.msra.mxu1 %v3951_v21 }
 0x456   :  { %2991 = vmatprep.subr.bf16.mxu0 %v3961_v28  ;;  %3020 = vmatprep.subr.bf16.mxu1 %v3282_v40 }
 0x459   :  { %2993 = vmatpush1.bf16.msra.mxu0 %v3973_v36  ;;  %3022 = vmatpush3.bf16.msra.mxu1 %v3979_v43 }
 0x45a   :  { %2995 = vmatprep.subr.bf16.mxu0 %v3989_v53  ;;  %3023 = vmatprep.subr.bf16.mxu1 %v3282_v40 }
 0x45d   :  { %2997 = vmatpush1.bf16.msra.mxu0 %v4001_v18  ;;  %3025 = vmatpush3.bf16.msra.mxu1 %v4007_v26 }
 0x45e   :  { %2999 = vmatprep.subr.bf16.mxu0 %v4017_v41  ;;  %3026 = vmatprep.subr.bf16.mxu1 %v3282_v40 }
 0x461   :  { %3001 = vmatpush1.bf16.msra.mxu0 %v4029_v55  ;;  %3028 = vmatpush3.bf16.msra.mxu1 %v4035_v61 }
 0x462   :  { %3003 = vmatprep.subr.bf16.mxu0 %v4048_v13  ;;  %3029 = vmatprep.subr.bf16.mxu1 %v3282_v40 }
 0x465   :  { %3005 = vmatpush1.bf16.msra.mxu0 %v4060_v24  ;;  %3031 = vmatpush3.bf16.msra.mxu1 %v4062_v33 }
 0x466   :  { %3007 = vmatprep.subr.bf16.mxu0 %v4074_v2  ;;  %3032 = vmatprep.subr.bf16.mxu1 %v3282_v40 }
 0x469   :  { %3009 = vmatpush1.bf16.msra.mxu0 %v4086_v42  ;;  %3034 = vmatpush3.bf16.msra.mxu1 %v4096_v19 }
 0x46a   :  { %3011 = vmatprep.subr.bf16.mxu0 %v4098_v22  ;;  %3035 = vmatprep.subr.bf16.mxu1 %v3282_v40 }
 0x46d   :  { %3013 = vmatpush1.bf16.msra.mxu0 %v4114_v37  ;;  %3037 = vmatpush3.bf16.msra.mxu1 %v4118_v48 }
 0x46e   :  { %3039 = vmatprep.subr.bf16.mxu0 %v3906_v52  ;;  %3070 = vmatprep.subr.bf16.mxu1 %v3282_v40 }
 0x523   :  { %v1361_v49 = vpop.f32.mrb[8].mxu0  ;;  %v1432_v30 = vpop.f32.mrb[16].mxu1 }
 0x524   :  { %v3167_v29 = vadd.f32 %v3790_v12, %v1361_v49  ;;  %v1363_v47 = vpop.f32.mrb[9].mxu0  ;;  %v2532_v60 = vpop.f32.mrb[17].mxu1  ;;  %v1433_v17 = vadd.f32 %v1432_v30, %v3796_v39 }
 0x525   :  { %v3169_v31 = vadd.f32 %v3792_v16, %v1363_v47 }
 0x526   :  { %v2142_v27 = vmul.f32 -1.442695, %v3167_v29 }
 0x527   :  { %v2143_v9 = vmul.f32 -1.442695, %v3169_v31 }
 0x528   :  { %3241 = vpow2.f32 %v2142_v27 }
 0x529   :  { %3243 = vpow2.f32 %v2143_v9 }
 0x532   :  { %v3242_v32 = vpop.eup %3241 }
 0x533   :  { %v1440_v50 = vadd.f32 1.0, %v3242_v32  ;;  %v3244_v57 = vpop.eup %3243 }
 0x534   :  { %v1447_v59 = vadd.f32 1.0, %v3244_v57 }
 0x535   :  { %3245 = vrcp.f32 %v1440_v50 }
 0x536   :  { %3247 = vrcp.f32 %v1447_v59 }
 0x53f   :  { %v3246_v25 = vpop.eup %3245 }
 0x540   :  { %v1450_v34 = vmul.f32 %v3246_v25, %v1433_v17  ;;  %v3248_v45 = vpop.eup %3247 }
 0x541   :  { %v1453_v46 = vsub.f32 1.0, %v3248_v45  ;;  %v1455_v1 = vmul.f32 %v3248_v45, %v4130_v11 }
 0x542   :  { %v1451_v35 = vadd.f32 %v1450_v34, %v3781_v58 }
 0x544   :  { %3249 = vtanh.f32 %v1451_v35 }
 0x54e   :  { %v3250_v51 = vpop.eup %3249 }
 0x54f   :  { %v1454_v56 = vmul.f32 %v3250_v51, %v1453_v46 }
 0x551   :  { %v4178_v4 = vadd.f32 %v1455_v1, %v1454_v56 }
 0x553   :  { %2144 = vst [vmem:[%s4282_s6 + $0x20] sm:$0xff] %v4178_v4  ;;  %1580 = vmatmul.mubr.f32.vlgmr.msra.gmra.mrb[10].mxu0 %v4178_v4  ;;  %2566 = vmatmul.mubr.f32.vlgmr.msra.gmra.mrb[18].mxu1 %v4178_v4 }
 0x554   :  { %3041 = vmatpush1.bf16.msra.mxu0 %v3917_v6  ;;  %3072 = vmatpush3.bf16.msra.mxu1 %v3923_v8 }
 0x555   :  { %3043 = vmatprep.subr.bf16.mxu0 %v3933_v38  ;;  %3073 = vmatprep.subr.bf16.mxu1 %v3282_v40 }
 0x556   :  { %1799 = vmatprep.mubr.f32.mxu0 %v3281_v3  ;;  %2600 = vmatprep.mubr.msk.f32.mxu1 %vm3283_vm0, %v3281_v3 }
 0x558   :  { %3045 = vmatpush1.bf16.msra.mxu0 %v3945_v14  ;;  %3075 = vmatpush3.bf16.msra.mxu1 %v3951_v21 }
 0x559   :  { %3047 = vmatprep.subr.bf16.mxu0 %v3961_v28  ;;  %3076 = vmatprep.subr.bf16.mxu1 %v3282_v40 }
 0x55c   :  { %3049 = vmatpush1.bf16.msra.mxu0 %v3973_v36  ;;  %3078 = vmatpush3.bf16.msra.mxu1 %v3979_v43 }
 0x55d   :  { %3051 = vmatprep.subr.bf16.mxu0 %v3989_v53  ;;  %3079 = vmatprep.subr.bf16.mxu1 %v3282_v40 }
 0x560   :  { %3053 = vmatpush1.bf16.msra.mxu0 %v4001_v18  ;;  %3081 = vmatpush3.bf16.msra.mxu1 %v4007_v26 }
 0x561   :  { %3055 = vmatprep.subr.bf16.mxu0 %v4017_v41  ;;  %3082 = vmatprep.subr.bf16.mxu1 %v3282_v40 }
 0x564   :  { %3057 = vmatpush1.bf16.msra.mxu0 %v4029_v55  ;;  %3084 = vmatpush3.bf16.msra.mxu1 %v4035_v61 }
 0x565   :  { %3059 = vmatprep.subr.bf16.mxu0 %v4048_v13  ;;  %3085 = vmatprep.subr.bf16.mxu1 %v3282_v40 }
 0x568   :  { %3061 = vmatpush1.bf16.msra.mxu0 %v4060_v24  ;;  %3087 = vmatpush3.bf16.msra.mxu1 %v4062_v33 }
 0x569   :  { %3063 = vmatprep.subr.bf16.mxu0 %v4074_v2  ;;  %3088 = vmatprep.subr.bf16.mxu1 %v3282_v40 }
 0x56c   :  { %3065 = vmatpush1.bf16.msra.mxu0 %v4086_v42  ;;  %3090 = vmatpush3.bf16.msra.mxu1 %v4096_v19 }
 0x56d   :  { %3067 = vmatprep.subr.bf16.mxu0 %v4098_v22  ;;  %3091 = vmatprep.subr.bf16.mxu1 %v3282_v40 }
 0x570   :  { %3069 = vmatpush1.bf16.msra.mxu0 %v4114_v37  ;;  %3093 = vmatpush3.bf16.msra.mxu1 %v4118_v48 }
 0x571   :  { %3095 = vmatprep.subr.bf16.mxu0 %v3906_v52  ;;  %3126 = vmatprep.subr.bf16.mxu1 %v3282_v40 }
 0x626   :  { %v1581_v58 = vpop.f32.mrb[10].mxu0  ;;  %v1652_v10 = vpop.f32.mrb[18].mxu1 }
 0x627   :  { %v3171_v15 = vadd.f32 %v3790_v12, %v1581_v58  ;;  %v1583_v20 = vpop.f32.mrb[11].mxu0  ;;  %v2567_v23 = vpop.f32.mrb[19].mxu1  ;;  %v1653_v52 = vadd.f32 %v1652_v10, %v3796_v39 }
 0x628   :  { %v3173_v62 = vadd.f32 %v3792_v16, %v1583_v20 }
 0x629   :  { %v2145_v44 = vmul.f32 -1.442695, %v3171_v15 }
 0x62a   :  { %v2146_v0 = vmul.f32 -1.442695, %v3173_v62 }
 0x62b   :  { %3251 = vpow2.f32 %v2145_v44 }
 0x62c   :  { %3253 = vpow2.f32 %v2146_v0 }
 0x635   :  { %v3252_v7 = vpop.eup %3251 }
 0x636   :  { %v1660_v11 = vadd.f32 1.0, %v3252_v7  ;;  %v3254_v49 = vpop.eup %3253 }
 0x637   :  { %v1667_v30 = vadd.f32 1.0, %v3254_v49 }
 0x638   :  { %3255 = vrcp.f32 %v1660_v11 }
 0x639   :  { %3257 = vrcp.f32 %v1667_v30 }
 0x642   :  { %v3256_v29 = vpop.eup %3255 }
 0x643   :  { %v1670_v47 = vmul.f32 %v3256_v29, %v1653_v52  ;;  %v3258_v27 = vpop.eup %3257 }
 0x644   :  { %v1673_v31 = vsub.f32 1.0, %v3258_v27  ;;  %v1675_v50 = vmul.f32 %v3258_v27, %v4178_v4 }
 0x645   :  { %v1671_v60 = vadd.f32 %v1670_v47, %v3779_v54 }
 0x647   :  { %3259 = vtanh.f32 %v1671_v60 }
 0x651   :  { %v3260_v9 = vpop.eup %3259 }
 0x652   :  { %v1674_v32 = vmul.f32 %v3260_v9, %v1673_v31 }
 0x654   :  { %v1676_v57 = vadd.f32 %v1675_v50, %v1674_v32 }
 0x656   :  { %2147 = vst [vmem:[%s4282_s6 + $0x28] sm:$0xff] %v1676_v57  ;;  %1800 = vmatmul.mubr.f32.vlgmr.msra.gmra.mrb[12].mxu0 %v1676_v57  ;;  %2601 = vmatmul.mubr.f32.vlgmr.msra.gmra.mrb[20].mxu1 %v1676_v57 }
 0x657   :  { %3097 = vmatpush1.bf16.msra.mxu0 %v3917_v6  ;;  %3128 = vmatpush3.bf16.msra.mxu1 %v3923_v8 }
 0x658   :  { %3099 = vmatprep.subr.bf16.mxu0 %v3933_v38  ;;  %3129 = vmatprep.subr.bf16.mxu1 %v3282_v40 }
 0x659   :  { %2019 = vmatprep.mubr.f32.mxu0 %v3281_v3  ;;  %2635 = vmatprep.mubr.msk.f32.mxu1 %vm3283_vm0, %v3281_v3 }
 0x65b   :  { %3101 = vmatpush1.bf16.msra.mxu0 %v3945_v14  ;;  %3131 = vmatpush3.bf16.msra.mxu1 %v3951_v21 }
 0x65c   :  { %3103 = vmatprep.subr.bf16.mxu0 %v3961_v28  ;;  %3132 = vmatprep.subr.bf16.mxu1 %v3282_v40 }
 0x65f   :  { %3105 = vmatpush1.bf16.msra.mxu0 %v3973_v36  ;;  %3134 = vmatpush3.bf16.msra.mxu1 %v3979_v43 }
 0x660   :  { %3107 = vmatprep.subr.bf16.mxu0 %v3989_v53  ;;  %3135 = vmatprep.subr.bf16.mxu1 %v3282_v40 }
 0x663   :  { %3109 = vmatpush1.bf16.msra.mxu0 %v4001_v18  ;;  %3137 = vmatpush3.bf16.msra.mxu1 %v4007_v26 }
 0x664   :  { %3111 = vmatprep.subr.bf16.mxu0 %v4017_v41  ;;  %3138 = vmatprep.subr.bf16.mxu1 %v3282_v40 }
 0x667   :  { %3113 = vmatpush1.bf16.msra.mxu0 %v4029_v55  ;;  %3140 = vmatpush3.bf16.msra.mxu1 %v4035_v61 }
 0x668   :  { %3115 = vmatprep.subr.bf16.mxu0 %v4048_v13  ;;  %3141 = vmatprep.subr.bf16.mxu1 %v3282_v40 }
 0x66b   :  { %3117 = vmatpush1.bf16.msra.mxu0 %v4060_v24  ;;  %3143 = vmatpush3.bf16.msra.mxu1 %v4062_v33 }
 0x66c   :  { %3119 = vmatprep.subr.bf16.mxu0 %v4074_v2  ;;  %3144 = vmatprep.subr.bf16.mxu1 %v3282_v40 }
 0x66f   :  { %3121 = vmatpush1.bf16.msra.mxu0 %v4086_v42  ;;  %3146 = vmatpush3.bf16.msra.mxu1 %v4096_v19 }
 0x670   :  { %3123 = vmatprep.subr.bf16.mxu0 %v4098_v22  ;;  %3147 = vmatprep.subr.bf16.mxu1 %v3282_v40 }
 0x673   :  { %3125 = vmatpush1.bf16.msra.mxu0 %v4114_v37  ;;  %3149 = vmatpush3.bf16.msra.mxu1 %v4118_v48 }
 0x729   :  { %v1801_v3 = vpop.f32.mrb[12].mxu0  ;;  %v1872_v54 = vpop.f32.mrb[20].mxu1 }
 0x72a   :  { %v3175_v6 = vadd.f32 %v3790_v12, %v1801_v3  ;;  %v1803_v8 = vpop.f32.mrb[13].mxu0  ;;  %v2602_v38 = vpop.f32.mrb[21].mxu1  ;;  %v1873_v18 = vadd.f32 %v1872_v54, %v3796_v39 }
 0x72b   :  { %v3177_v21 = vadd.f32 %v3792_v16, %v1803_v8 }
 0x72c   :  { %v2148_v14 = vmul.f32 -1.442695, %v3175_v6 }
 0x72d   :  { %v2149_v28 = vmul.f32 -1.442695, %v3177_v21 }
 0x72e   :  { %3261 = vpow2.f32 %v2148_v14 }
 0x72f   :  { %3263 = vpow2.f32 %v2149_v28 }
 0x738   :  { %v3262_v36 = vpop.eup %3261 }
 0x739   :  { %v1880_v43 = vadd.f32 1.0, %v3262_v36  ;;  %v3264_v40 = vpop.eup %3263 }
 0x73a   :  { %v1887_v53 = vadd.f32 1.0, %v3264_v40 }
 0x73b   :  { %3265 = vrcp.f32 %v1880_v43 }
 0x73c   :  { %3267 = vrcp.f32 %v1887_v53 }
 0x745   :  { %v3266_v26 = vpop.eup %3265 }
 0x746   :  { %v1890_v41 = vmul.f32 %v3266_v26, %v1873_v18  ;;  %v3268_v61 = vpop.eup %3267 }
 0x747   :  { %v1893_v13 = vsub.f32 1.0, %v3268_v61  ;;  %v1895_v2 = vmul.f32 %v3268_v61, %v1676_v57 }
 0x748   :  { %v1891_v55 = vadd.f32 %v1890_v41, %v3788_v5 }
 0x74a   :  { %3269 = vtanh.f32 %v1891_v55 }
 0x754   :  { %v3270_v24 = vpop.eup %3269 }
 0x755   :  { %v1894_v33 = vmul.f32 %v3270_v24, %v1893_v13 }
 0x757   :  { %v1896_v42 = vadd.f32 %v1895_v2, %v1894_v33 }
 0x759   :  { %2150 = vst [vmem:[%s4282_s6 + $0x30] sm:$0xff] %v1896_v42  ;;  %2020 = vmatmul.mubr.f32.vlgmr.msra.gmra.mrb[14].mxu0 %v1896_v42  ;;  %2636 = vmatmul.mubr.f32.vlgmr.msra.gmra.mrb[22].mxu1 %v1896_v42 }
 0x82c   :  { %v2021_v19 = vpop.f32.mrb[14].mxu0  ;;  %v2092_v22 = vpop.f32.mrb[22].mxu1 }
 0x82d   :  { %v3179_v37 = vadd.f32 %v3790_v12, %v2021_v19  ;;  %v2023_v48 = vpop.f32.mrb[15].mxu0  ;;  %v2637_v59 = vpop.f32.mrb[23].mxu1  ;;  %v2093_v51 = vadd.f32 %v2092_v22, %v3796_v39 }
 0x82e   :  { %v3181_v17 = vadd.f32 %v3792_v16, %v2023_v48 }
 0x82f   :  { %v2151_v5 = vmul.f32 -1.442695, %v3179_v37 }
 0x830   :  { %v2152_v25 = vmul.f32 -1.442695, %v3181_v17 }
 0x831   :  { %3271 = vpow2.f32 %v2151_v5 }
 0x832   :  { %3273 = vpow2.f32 %v2152_v25 }
 0x83b   :  { %v3272_v34 = vpop.eup %3271 }
 0x83c   :  { %v2100_v35 = vadd.f32 1.0, %v3272_v34  ;;  %v3274_v45 = vpop.eup %3273 }
 0x83d   :  { %v2107_v46 = vadd.f32 1.0, %v3274_v45 }
 0x83e   :  { %3275 = vrcp.f32 %v2100_v35 }
 0x83f   :  { %3277 = vrcp.f32 %v2107_v46 }
 0x848   :  { %v3276_v56 = vpop.eup %3275 }
 0x849   :  { %v2110_v1 = vmul.f32 %v3276_v56, %v2093_v51  ;;  %v3278_v4 = vpop.eup %3277 }
 0x84a   :  { %v2113_v58 = vsub.f32 1.0, %v3278_v4  ;;  %v2115_v15 = vmul.f32 %v3278_v4, %v1896_v42 }
 0x84b   :  { %v2111_v12 = vadd.f32 %v2110_v1, %v3786_v63 }
 0x84d   :  { %3279 = vtanh.f32 %v2111_v12 }
 0x857   :  { %v3280_v10 = vpop.eup %3279 }
 0x858   :  { %v2114_v16 = vmul.f32 %v3280_v10, %v2113_v58 }
 0x85a   :  { %v2116_v20 = vadd.f32 %v2115_v15, %v2114_v16 }
 0x85c   :  { %2153 = vst [vmem:[%s4282_s6 + $0x38] sm:$0xff] %v2116_v20 }

</bundles_post_ra>
